<compile_context>
chip_gen: v5e
topology: v5e:2x2
jax: 0.10.0
libtpu: 0.0.40
codegen_flags: <defaults>
</compile_context>

<pallas_src>
import functools

import jax
import jax.numpy as jnp
from jax.experimental import pallas as pl
from jax.experimental.pallas import tpu as pltpu


def _layernorm_kernel(x_ref, params_ref, o_ref, *, eps):
    x = x_ref[...].astype(jnp.float32)                  # (TR, C)
    gamma = params_ref[0:1, :].astype(jnp.float32)      # (1, C) — loaded once
    beta = params_ref[1:2, :].astype(jnp.float32)       # (1, C) — loaded once

    c_inv = 1.0 / x.shape[-1]
    # Two-pass (centered) statistics: numerically robust, and free here since
    # the kernel is HBM-bandwidth bound.
    mean = jnp.sum(x, axis=-1, keepdims=True) * c_inv   # (TR, 1)
    xc = x - mean
    var = jnp.sum(xc * xc, axis=-1, keepdims=True) * c_inv
    inv = jax.lax.rsqrt(var + eps)
    y = xc * inv * gamma + beta
    o_ref[...] = y.astype(o_ref.dtype)


def _round_up(a, b):
    return (a + b - 1) // b * b


def layernorm(x, gamma, beta, *, eps=1e-6):
    """x: (..., C); gamma/beta: (C,). Normalizes over the last axis."""
    orig_shape = x.shape
    C = orig_shape[-1]
    R = 1
    for d in orig_shape[:-1]:
        R *= d
    x2 = x.reshape(R, C)
    # One (2, C) params operand: [gamma; beta]. Single constant-index DMA,
    # stays VMEM-resident across grid steps.
    params = jnp.concatenate([gamma.reshape(1, C), beta.reshape(1, C)], axis=0)

    kernel = functools.partial(_layernorm_kernel, eps=eps)
    itemsize = jnp.dtype(x.dtype).itemsize

    # ---- Small-R fast path: one full-array block, one grid step. ----------
    # Full-extent blocks are exempt from the (8, 128) divisibility rule, so
    # R=196 needs no padding/masking and there is zero per-step grid overhead.
    MAX_SINGLE_BLOCK_BYTES = 4 * 1024 * 1024
    if R * C * itemsize <= MAX_SINGLE_BLOCK_BYTES:
        out = pl.pallas_call(
            kernel,
            out_shape=jax.ShapeDtypeStruct((R, C), x.dtype),
            grid=(1,),
            in_specs=[
                pl.BlockSpec((R, C), lambda i: (0, 0)),
                pl.BlockSpec((2, C), lambda i: (0, 0)),
            ],
            out_specs=pl.BlockSpec((R, C), lambda i: (0, 0)),
        )(x2, params)
        return out.reshape(orig_shape)

    # ---- Large-R reuse path: row-tiled, pipelined. -------------------------
    # Target ~2 MiB per block so the double-buffered footprint
    # (x + out, 2 buffers each) stays < ~9 MiB — under the 16 MiB scoped-VMEM
    # default on v5e and well under v6e/v7x limits — while keeping blocks big
    # enough to sit near the HBM roofline (~85% at 512+ wide tiles).
    target_block_bytes = 2 * 1024 * 1024
    rows_for_target = max(1, target_block_bytes // max(C * itemsize, 1))
    TR = max(8, min(1024, _round_up(rows_for_target, 8)))
    TR = min(TR, _round_up(R, 8))
    grid = (pl.cdiv(R, TR),)

    out = pl.pallas_call(
        kernel,
        out_shape=jax.ShapeDtypeStruct((R, C), x.dtype),
        grid=grid,
        in_specs=[
            pl.BlockSpec((TR, C), lambda i: (i, 0)),
            pl.BlockSpec((2, C), lambda i: (0, 0)),   # params: resident across steps
        ],
        out_specs=pl.BlockSpec((TR, C), lambda i: (i, 0)),
        compiler_params=pltpu.CompilerParams(
            dimension_semantics=("parallel",),
            vmem_limit_bytes=32 * 1024 * 1024,  # explicit budget; fits every generation
        ),
    )(x2, params)
    return out.reshape(orig_shape)


if __name__ == "__main__":
    key = jax.random.PRNGKey(0)
    k_x, k_g, k_b = jax.random.split(key, 3)

    # Input matching the PyTorch module: [1, 14, 14, 512]
    x = jax.random.normal(k_x, (1, 14, 14, 512), dtype=jnp.float32)

    # PyTorch default init is gamma=1, beta=0; perturb slightly so the affine
    # path is actually exercised.
    C = 512
    gamma = jnp.ones((C,), jnp.float32) + 0.01 * jax.random.normal(k_g, (C,), jnp.float32)
    beta = 0.01 * jax.random.normal(k_b, (C,), jnp.float32)

    y = layernorm(x, gamma, beta, eps=1e-6)
    jax.block_until_ready(y)

    # Reference check in plain JAX (two-pass variance), matches nn.LayerNorm.
    mean = jnp.mean(x, axis=-1, keepdims=True)
    var = jnp.mean((x - mean) ** 2, axis=-1, keepdims=True)
    ref = (x - mean) * jax.lax.rsqrt(var + 1e-6) * gamma + beta
    assert jnp.allclose(y, ref, atol=1e-4, rtol=1e-4), "mismatch vs reference"

    print("KERNEL_OK")
</pallas_src>

<mosaic_0001>
module attributes {stable_mosaic.version = 11 : i64} {
  func.func @_layernorm_kernel(%arg0: i32, %arg1: memref<196x512xf32, #tpu.memory_space<vmem>>, %arg2: memref<2x512xf32, #tpu.memory_space<vmem>>, %arg3: memref<196x512xf32, #tpu.memory_space<vmem>>) attributes {dimension_semantics = [#tpu.dimension_semantics<arbitrary>], iteration_bounds = array<i64: 1>, scalar_prefetch = 0 : i64, scratch_operands = 0 : i64, tpu.core_type = #tpu.core_type<tc>, window_params = [{pipeline_mode = #tpu.pipeline_mode<synchronous>, transform_indices = @transform_0, window_bounds = array<i64: 196, 512>}, {pipeline_mode = #tpu.pipeline_mode<synchronous>, transform_indices = @transform_1, window_bounds = array<i64: 2, 512>}, {pipeline_mode = #tpu.pipeline_mode<synchronous>, transform_indices = @transform_2, window_bounds = array<i64: 196, 512>}]} {
    %c0 = arith.constant 0 : index
    %c0_0 = arith.constant 0 : index
    %0 = vector.load %arg1[%c0, %c0_0] : memref<196x512xf32, #tpu.memory_space<vmem>>, vector<196x512xf32>
    %c0_1 = arith.constant 0 : index
    %c0_2 = arith.constant 0 : index
    %1 = vector.load %arg2[%c0_1, %c0_2] : memref<2x512xf32, #tpu.memory_space<vmem>>, vector<1x512xf32>
    %c1 = arith.constant 1 : index
    %c0_3 = arith.constant 0 : index
    %2 = vector.load %arg2[%c1, %c0_3] : memref<2x512xf32, #tpu.memory_space<vmem>>, vector<1x512xf32>
    %cst = arith.constant dense<0.000000e+00> : vector<196xf32>
    %3 = vector.multi_reduction <add>, %0, %cst [1] : vector<196x512xf32> to vector<196xf32>
    %4 = vector.shape_cast %3 : vector<196xf32> to vector<196x1xf32>
    %cst_4 = arith.constant 0.001953125 : f32
    %5 = vector.broadcast %cst_4 : f32 to vector<196x1xf32>
    %6 = arith.mulf %4, %5 : vector<196x1xf32>
    %7 = vector.broadcast %6 : vector<196x1xf32> to vector<196x512xf32>
    %8 = arith.subf %0, %7 : vector<196x512xf32>
    %9 = arith.mulf %8, %8 : vector<196x512xf32>
    %cst_5 = arith.constant dense<0.000000e+00> : vector<196xf32>
    %10 = vector.multi_reduction <add>, %9, %cst_5 [1] : vector<196x512xf32> to vector<196xf32>
    %11 = vector.shape_cast %10 : vector<196xf32> to vector<196x1xf32>
    %cst_6 = arith.constant 0.001953125 : f32
    %12 = vector.broadcast %cst_6 : f32 to vector<196x1xf32>
    %13 = arith.mulf %11, %12 : vector<196x1xf32>
    %cst_7 = arith.constant 9.99999997E-7 : f32
    %14 = vector.broadcast %cst_7 : f32 to vector<196x1xf32>
    %15 = arith.addf %13, %14 : vector<196x1xf32>
    %16 = math.rsqrt %15 : vector<196x1xf32>
    %17 = vector.broadcast %16 : vector<196x1xf32> to vector<196x512xf32>
    %18 = arith.mulf %8, %17 : vector<196x512xf32>
    %19 = vector.broadcast %1 : vector<1x512xf32> to vector<196x512xf32>
    %20 = arith.mulf %18, %19 : vector<196x512xf32>
    %21 = vector.broadcast %2 : vector<1x512xf32> to vector<196x512xf32>
    %22 = arith.addf %20, %21 : vector<196x512xf32>
    %c0_8 = arith.constant 0 : index
    %c0_9 = arith.constant 0 : index
    %23 = vector.load %arg3[%c0_8, %c0_9] : memref<196x512xf32, #tpu.memory_space<vmem>>, vector<196x512xf32>
    tpu.vector_store %arg3[%c0_8, %c0_9], %22 {strides = array<i32>} : memref<196x512xf32, #tpu.memory_space<vmem>>, vector<196x512xf32>,
    return
  }
  func.func @transform_0(%arg0: i32) -> (i32, i32) {
    %c0_i32 = arith.constant 0 : i32
    %c0_i32_0 = arith.constant 0 : i32
    %c0_i32_1 = arith.constant 0 : i32
    return %c0_i32, %c0_i32_0 : i32, i32
  }
  func.func @transform_1(%arg0: i32) -> (i32, i32) {
    %c0_i32 = arith.constant 0 : i32
    %c0_i32_0 = arith.constant 0 : i32
    %c0_i32_1 = arith.constant 0 : i32
    return %c0_i32, %c0_i32_0 : i32, i32
  }
  func.func @transform_2(%arg0: i32) -> (i32, i32) {
    %c0_i32 = arith.constant 0 : i32
    %c0_i32_0 = arith.constant 0 : i32
    %c0_i32_1 = arith.constant 0 : i32
    return %c0_i32, %c0_i32_0 : i32, i32
  }
}

</mosaic_0001>

<bundles_post_ra>
// kernel: tpu_custom_call.1
= control target key start
LH: loop header
LB: loop body
LE: loop exit
PB: predicated region body
PF: predicated region fallthrough
CT: control target
= control target key end

     0   :  { %7 = vsyncpa [#allocation3], 0  ;;  %s3008_s0 = inlined_call_operand.hbm [shape: f32[196,512], index: 0, kind: input, shape index: {}]   ;;  %s3009_s1 = inlined_call_operand.hbm [shape: f32[2,512], index: 1, kind: input, shape index: {}]   ;;  %s3010_s2 = inlined_call_operand.hbm [shape: f32[196,512], index: 2, kind: output, shape index: {}]  }
   0x1   :  { %8 = vsyncpa [#allocation6], 0 }
   0x2   :  { %9 = vsyncpa [#allocation4], 0  ;;  %s14_s11 = sshll.u32 %s3008_s0, 4  ;;  %s1500_s12 = smov [#allocation2]   ;;  %s15_s11 = int_to_ptr.hbm [resolvable:$true] %s14_s11 }
   0x3   :  { %s16_s13 = sshll.u32 %s1500_s12, 4  ;;  %s28_s16 = sshll.u32 %s3009_s1, 4  ;;  %s17_s13 = int_to_ptr.vmem [resolvable:$true] %s16_s13  ;;  %s29_s16 = int_to_ptr.hbm [resolvable:$true] %s28_s16 }
   0x4   :  { %s1501_s17 = smov 512   ;;  %s1502_s18 = smov 32  }
   0x5   :  { %22 = dma.hbm_to_vmem [thread:$0]  %s15_s11, 12800, %s17_s13, [#allocation3], %s1501_s17, %s1501_s17, %s1502_s18  }
   0x6   :  { %s1503_s19 = smov [#allocation5]  }
   0x7   :  { %s30_s20 = sshll.u32 %s1503_s19, 4  ;;  %s31_s20 = int_to_ptr.vmem [resolvable:$true] %s30_s20 }
   0x8   :  { %33 = dma.hbm_to_vmem [thread:$0]  %s29_s16, 128, %s31_s20, [#allocation6]  }
   0x9   :  { %1494 = dma.done.wait [#allocation3], 12800  }
   0xa   :  { %1495 = vsyncadd [#allocation3], 4294954496 }
   0xb   :  { %1496 = dma.done.wait [#allocation6], 128  }
   0xc   :  { %1497 = vsyncadd [#allocation6], 4294967168  ;;  %v1529_v0 = vld [vmem:[#allocation2 + $0x80] sm:$0xff]  ;;  %v1531_v1 = vld [vmem:[#allocation2 + $0x88] sm:$0xff]  ;;  %vm265_vm0 = vcmask 1043456   ;;  %s1504_s0 = smov [#allocation7]  }
   0xd   :  { %v1533_v2 = vld [vmem:[#allocation2 + $0x90] sm:$0xff]  ;;  %v165_v3 = vadd.f32 %v1531_v1, %v1529_v0  ;;  %v1537_v4 = vld [vmem:[#allocation2 + $0x40] sm:$0xff]  ;;  %v1539_v5 = vld [vmem:[#allocation2 + $0x48] sm:$0xff]  ;;  %s1351_s1 = sshll.u32 %s1504_s0, 4  ;;  %s1353_s23 = sshll.u32 %s3010_s2, 4  ;;  %s1352_s1 = int_to_ptr.vmem [resolvable:$true] %s1351_s1  ;;  %s1354_s23 = int_to_ptr.hbm [resolvable:$true] %s1353_s23 }
   0xe   :  { %v1541_v6 = vld [vmem:[#allocation2 + $0x98] sm:$0xff]  ;;  %v1543_v7 = vld [vmem:[#allocation2 + $0x50] sm:$0xff]  ;;  %v155_v8 = vadd.f32 %v1539_v5, %v1537_v4  ;;  %v1547_v9 = vld [vmem:[#allocation2] sm:$0xff] }
   0xf   :  { %v166_v10 = vadd.f32 %v165_v3, %v1533_v2  ;;  %v1550_v11 = vld [vmem:[#allocation2 + $0x58] sm:$0xff]  ;;  %v1552_v12 = vld [vmem:[#allocation2 + $0x8] sm:$0xff]  ;;  %v1554_v13 = vld [vmem:[#allocation2 + $0x10] sm:$0xff] }
  0x10   :  { %v156_v14 = vadd.f32 %v155_v8, %v1543_v7  ;;  %v145_v15 = vadd.f32 %v1552_v12, %v1547_v9  ;;  %v1559_v16 = vld [vmem:[#allocation2 + $0xa0] sm:$0xff]  ;;  %v1561_v17 = vld [vmem:[#allocation2 + $0xa8] sm:$0xff]  ;;  %v1563_v18 = vld [vmem:[#allocation2 + $0xb0] sm:$0xff] }
  0x11   :  { %v167_v19 = vadd.f32 %v166_v10, %v1541_v6  ;;  %v1566_v20 = vld [vmem:[#allocation2 + $0x18] sm:$0xff]  ;;  %v170_v21 = vadd.f32 %v1561_v17, %v1559_v16  ;;  %v1570_v22 = vld [vmem:[#allocation2 + $0x60] sm:$0xff]  ;;  %v1572_v23 = vld [vmem:[#allocation2 + $0x68] sm:$0xff] }
  0x12   :  { %v157_v24 = vadd.f32 %v156_v14, %v1550_v11  ;;  %v146_v25 = vadd.f32 %v145_v15, %v1554_v13  ;;  %v1576_v26 = vld [vmem:[#allocation2 + $0x70] sm:$0xff]  ;;  %v160_v27 = vadd.f32 %v1572_v23, %v1570_v22  ;;  %v1580_v28 = vld [vmem:[#allocation2 + $0x20] sm:$0xff]  ;;  %v1583_v30 = vld [vmem:[#allocation2 + $0x28] sm:$0xff] }
  0x13   :  { %168 = vadd.xlane.f32.xlu2 %v167_v19  ;;  %v171_v29 = vadd.f32 %v170_v21, %v1563_v18  ;;  %v1585_v31 = vld [vmem:[#allocation2 + $0x30] sm:$0xff]  ;;  %v1588_v33 = vld [vmem:[#allocation2 + $0xb8] sm:$0xff]  ;;  %v150_v35 = vadd.f32 %v1583_v30, %v1580_v28  ;;  %v1593_v36 = vld [vmem:[#allocation2 + $0x100] sm:$0xff] }
  0x14   :  { %158 = vadd.xlane.f32.xlu1 %v157_v24  ;;  %v147_v32 = vadd.f32 %v146_v25, %v1566_v20  ;;  %v161_v34 = vadd.f32 %v160_v27, %v1576_v26  ;;  %v1595_v37 = vld [vmem:[#allocation2 + $0x108] sm:$0xff]  ;;  %v1597_v38 = vld [vmem:[#allocation2 + $0x78] sm:$0xff]  ;;  %v1599_v39 = vld [vmem:[#allocation2 + $0xe0] sm:$0xff] }
  0x15   :  { %v1601_v40 = vld [vmem:[#allocation2 + $0xe8] sm:$0xff]  ;;  %v151_v41 = vadd.f32 %v150_v35, %v1585_v31  ;;  %v172_v42 = vadd.f32 %v171_v29, %v1588_v33  ;;  %v1605_v43 = vld [vmem:[#allocation2 + $0x38] sm:$0xff]  ;;  %v185_v44 = vadd.f32 %v1595_v37, %v1593_v36  ;;  %v1609_v45 = vld [vmem:[#allocation2 + $0xc0] sm:$0xff] }
  0x16   :  { %148 = vadd.xlane.f32.xlu0 %v147_v32  ;;  %v1611_v46 = vld [vmem:[#allocation2 + $0xc8] sm:$0xff]  ;;  %v162_v47 = vadd.f32 %v161_v34, %v1597_v38  ;;  %v1614_v48 = vld [vmem:[#allocation2 + $0x110] sm:$0xff]  ;;  %v180_v49 = vadd.f32 %v1601_v40, %v1599_v39  ;;  %v1623_v53 = vld [vmem:[#allocation2 + $0x300] sm:$0xf] }
  0x17   :  { %v1618_v50 = vld [vmem:[#allocation2 + $0xf0] sm:$0xff]  ;;  %v152_v51 = vadd.f32 %v151_v41, %v1605_v43  ;;  %v175_v52 = vadd.f32 %v1611_v46, %v1609_v45  ;;  %v1625_v54 = vld [vmem:[#allocation2 + $0x308] sm:$0xf]  ;;  %v186_v55 = vadd.f32 %v185_v44, %v1614_v48  ;;  %v1630_v57 = vld [vmem:[#allocation2 + $0x118] sm:$0xff]  ;;  %v266_v62 = vsel %vm265_vm0, %v1623_v53, 0.0 }
  0x18   :  { %v1628_v56 = vld [vmem:[#allocation2 + $0xd0] sm:$0xff]  ;;  %v181_v58 = vadd.f32 %v180_v49, %v1618_v50  ;;  %v1633_v59 = vld [vmem:[#allocation2 + $0x140] sm:$0xff]  ;;  %v1635_v60 = vld [vmem:[#allocation2 + $0x148] sm:$0xff]  ;;  %v267_v63 = vsel %vm265_vm0, %v1625_v54, 0.0 }
  0x19   :  { %v1637_v61 = vld [vmem:[#allocation2 + $0xf8] sm:$0xff]  ;;  %v176_v3 = vadd.f32 %v175_v52, %v1628_v56  ;;  %v1644_v8 = vld [vmem:[#allocation2 + $0x310] sm:$0xf]  ;;  %v187_v10 = vadd.f32 %v186_v55, %v1630_v57  ;;  %v1649_v15 = vld [vmem:[#allocation2 + $0x120] sm:$0xff]  ;;  %v195_v21 = vadd.f32 %v1635_v60, %v1633_v59  ;;  %v268_v25 = vadd.f32 %v267_v63, %v266_v62 }
  0x1a   :  { %3129 = vst [vmem:[#allocation11_spill] sm:$0xff] %v1644_v8  ;;  %v1647_v14 = vld [vmem:[#allocation2 + $0xd8] sm:$0xff]  ;;  %v1651_v19 = vld [vmem:[#allocation2 + $0x128] sm:$0xff]  ;;  %v182_v24 = vadd.f32 %v181_v58, %v1637_v61  ;;  %v1656_v27 = vld [vmem:[#allocation2 + $0x150] sm:$0xff]  ;;  %v269_v29 = vsel %vm265_vm0, %v1644_v8, 0.0 }
  0x1b   :  { %173 = vadd.xlane.f32.xlu2 %v172_v42  ;;  %3130 = vst [vmem:[#allocation12_spill] sm:$0xff] %v1656_v27  ;;  %v177_v32 = vadd.f32 %v176_v3, %v1647_v14  ;;  %v1661_v34 = vld [vmem:[#allocation2 + $0x318] sm:$0xf]  ;;  %v190_v35 = vadd.f32 %v1651_v19, %v1649_v15  ;;  %v1665_v41 = vld [vmem:[#allocation2 + $0x130] sm:$0xff]  ;;  %v196_v42 = vadd.f32 %v195_v21, %v1656_v27  ;;  %v1670_v49 = vld [vmem:[#allocation2 + $0x1a0] sm:$0xff] }
  0x1c   :  { %163 = vadd.xlane.f32.xlu1 %v162_v47  ;;  %3131 = vst [vmem:[#allocation13_spill] sm:$0xff] %v1661_v34  ;;  %v270_v44 = vadd.f32 %v269_v29, %v268_v25  ;;  %v1668_v47 = vld [vmem:[#allocation2 + $0x158] sm:$0xff]  ;;  %v271_v52 = vsel %vm265_vm0, %v1661_v34, 0.0  ;;  %v1676_v55 = vld [vmem:[#allocation2 + $0x180] sm:$0xff]  ;;  %v1678_v58 = vld [vmem:[#allocation2 + $0x188] sm:$0xff] }
  0x1d   :  { %3132 = vst [vmem:[#allocation14_spill] sm:$0xff] %v1668_v47  ;;  %v191_v62 = vadd.f32 %v190_v35, %v1665_v41  ;;  %v1681_v63 = vld [vmem:[#allocation2 + $0x138] sm:$0xff]  ;;  %v197_v3 = vadd.f32 %v196_v42, %v1668_v47  ;;  %v1686_v21 = vld [vmem:[#allocation2 + $0x168] sm:$0xff]  ;;  %v205_v29 = vadd.f32 %v1678_v58, %v1676_v55  ;;  %v1692_v34 = vld [vmem:[#allocation2 + $0x1b0] sm:$0xff] }
  0x1e   :  { %153 = vadd.xlane.f32.xlu0 %v152_v51  ;;  %3133 = vst [vmem:[#allocation15_spill] sm:$0xff] %v1670_v49  ;;  %v1672_v51 = vld [vmem:[#allocation2 + $0x1a8] sm:$0xff]  ;;  %v272_v25 = vadd.f32 %v271_v52, %v270_v44  ;;  %v1699_v8 = vld [vmem:[#allocation2 + $0x170] sm:$0xff]  ;;  %v1703_v52 = vld [vmem:[#allocation2 + $0x1b8] sm:$0xff] }
  0x1f   :  { %3134 = vst [vmem:[#allocation16_spill] sm:$0xff] %v1672_v51  ;;  %v192_v35 = vadd.f32 %v191_v62, %v1681_v63  ;;  %v1711_v62 = vld [vmem:[#allocation2 + $0x1e0] sm:$0xff]  ;;  %v1728_v27 = vld [vmem:[#allocation2 + $0x210] sm:$0xff] }
  0x20   :  { %3135 = vst [vmem:[#allocation17_spill] sm:$0xff] %v1676_v55  ;;  %v1709_v55 = vld [vmem:[#allocation2 + $0x198] sm:$0xff] }
  0x21   :  { %3136 = vst [vmem:[#allocation18_spill] sm:$0xff] %v1678_v58  ;;  %v1707_v58 = vld [vmem:[#allocation2 + $0x208] sm:$0xff] }
  0x22   :  { %3138 = vst [vmem:[#allocation20_spill] sm:$0xff] %v1686_v21 }
  0x23   :  { %188 = vadd.xlane.f32.xlu2 %v187_v10  ;;  %v1684_v10 = vld [vmem:[#allocation2 + $0x160] sm:$0xff]  ;;  %3139 = vst [vmem:[#allocation21_spill] sm:$0xff] %v1692_v34 }
  0x24   :  { %183 = vadd.xlane.f32.xlu1 %v182_v24  ;;  %3137 = vst [vmem:[#allocation19_spill] sm:$0xff] %v1684_v10  ;;  %v210_v24 = vadd.f32 %v1672_v51, %v1670_v49  ;;  %v200_v42 = vadd.f32 %v1686_v21, %v1684_v10  ;;  %v1705_v51 = vld [vmem:[#allocation2 + $0x200] sm:$0xff]  ;;  %v1713_v49 = vld [vmem:[#allocation2 + $0x1e8] sm:$0xff]  ;;  %v1716_v21 = vld [vmem:[#allocation2 + $0x178] sm:$0xff] }
  0x25   :  { %3141 = vst [vmem:[#allocation23_spill] sm:$0xff] %v1699_v8 }
  0x26   :  { %178 = vadd.xlane.f32.xlu0 %v177_v32  ;;  %v1694_v32 = vld [vmem:[#allocation2 + $0x190] sm:$0xff]  ;;  %v211_v47 = vadd.f32 %v210_v24, %v1692_v34  ;;  %3142 = vst [vmem:[#allocation24_spill] sm:$0xff] %v1703_v52  ;;  %v225_v34 = vadd.f32 %v1707_v58, %v1705_v51 }
  0x27   :  { %3140 = vst [vmem:[#allocation22_spill] sm:$0xff] %v1694_v32  ;;  %v206_v44 = vadd.f32 %v205_v29, %v1694_v32  ;;  %v1721_v29 = vld [vmem:[#allocation2 + $0x1c8] sm:$0xff]  ;;  %v220_v32 = vadd.f32 %v1713_v49, %v1711_v62 }
  0x28   :  { %3143 = vst [vmem:[#allocation25_spill] sm:$0xff] %v1705_v51  ;;  %v212_v24 = vadd.f32 %v211_v47, %v1703_v52  ;;  %v1735_v52 = vld [vmem:[#allocation2 + $0x1d0] sm:$0xff]  ;;  %v1741_v51 = vld [vmem:[#allocation2 + $0x260] sm:$0xff] }
  0x29   :  { %3144 = vst [vmem:[#allocation26_spill] sm:$0xff] %v1707_v58  ;;  %v207_v10 = vadd.f32 %v206_v44, %v1709_v55  ;;  %v1739_v58 = vld [vmem:[#allocation2 + $0x218] sm:$0xff] }
  0x2a   :  { %3145 = vst [vmem:[#allocation27_spill] sm:$0xff] %v1709_v55  ;;  %v1764_v55 = vld [vmem:[#allocation2 + $0x270] sm:$0xff] }
  0x2b   :  { %198 = vadd.xlane.f32.xlu2 %v197_v3  ;;  %3146 = vst [vmem:[#allocation28_spill] sm:$0xff] %v1711_v62  ;;  %v201_v3 = vadd.f32 %v200_v42, %v1699_v8  ;;  %v226_v8 = vadd.f32 %v225_v34, %v1728_v27  ;;  %v1745_v62 = vld [vmem:[#allocation2 + $0x1f8] sm:$0xff] }
  0x2c   :  { %273 = vadd.xlane.f32.xlu1 %v272_v25  ;;  %3147 = vst [vmem:[#allocation29_spill] sm:$0xff] %v1713_v49  ;;  %v1719_v25 = vld [vmem:[#allocation2 + $0x1c0] sm:$0xff]  ;;  %v1743_v49 = vld [vmem:[#allocation2 + $0x268] sm:$0xff] }
  0x2d   :  { %3148 = vst [vmem:[#allocation30_spill] sm:$0xff] %v1716_v21  ;;  %v202_v42 = vadd.f32 %v201_v3, %v1716_v21  ;;  %v215_v47 = vadd.f32 %v1721_v29, %v1719_v25  ;;  %v1747_v3 = vld [vmem:[#allocation2 + $0x240] sm:$0xff]  ;;  %v1749_v21 = vld [vmem:[#allocation2 + $0x248] sm:$0xff]  ;;  %v227_v34 = vadd.f32 %v226_v8, %v1739_v58 }
  0x2e   :  { %193 = vadd.xlane.f32.xlu0 %v192_v35  ;;  %3149 = vst [vmem:[#allocation31_spill] sm:$0xff] %v1719_v25  ;;  %v1730_v35 = vld [vmem:[#allocation2 + $0x1f0] sm:$0xff]  ;;  %v235_v25 = vadd.f32 %v1749_v21, %v1747_v3 }
  0x2f   :  { %3150 = vst [vmem:[#allocation32_spill] sm:$0xff] %v1721_v29  ;;  %v221_v44 = vadd.f32 %v220_v32, %v1730_v35  ;;  %v1752_v29 = vld [vmem:[#allocation2 + $0x1d8] sm:$0xff]  ;;  %v1757_v32 = vld [vmem:[#allocation2 + $0x228] sm:$0xff] }
  0x30   :  { %3151 = vst [vmem:[#allocation33_spill] sm:$0xff] %v1728_v27  ;;  %v240_v27 = vadd.f32 %v1743_v49, %v1741_v51 }
  0x31   :  { %3152 = vst [vmem:[#allocation34_spill] sm:$0xff] %v1730_v35  ;;  %v222_v35 = vadd.f32 %v221_v44, %v1745_v62 }
  0x32   :  { %3153 = vst [vmem:[#allocation35_spill] sm:$0xff] %v1735_v52 }
  0x33   :  { %213 = vadd.xlane.f32.xlu2 %v212_v24  ;;  %3154 = vst [vmem:[#allocation36_spill] sm:$0xff] %v1739_v58  ;;  %v216_v24 = vadd.f32 %v215_v47, %v1735_v52  ;;  %v1771_v58 = vld [vmem:[#allocation2 + $0x230] sm:$0xff]  ;;  %v241_v52 = vadd.f32 %v240_v27, %v1764_v55 }
  0x34   :  { %208 = vadd.xlane.f32.xlu1 %v207_v10  ;;  %3155 = vst [vmem:[#allocation37_spill] sm:$0xff] %v1741_v51  ;;  %v1755_v10 = vld [vmem:[#allocation2 + $0x220] sm:$0xff]  ;;  %v1781_v51 = vld [vmem:[#allocation2 + $0x258] sm:$0xff] }
  0x35   :  { %3156 = vst [vmem:[#allocation38_spill] sm:$0xff] %v1743_v49  ;;  %v217_v47 = vadd.f32 %v216_v24, %v1752_v29  ;;  %v230_v8 = vadd.f32 %v1757_v32, %v1755_v10  ;;  %v1775_v49 = vld [vmem:[#allocation2 + $0x278] sm:$0xff]  ;;  %v1783_v24 = vld [vmem:[#allocation2 + $0x2a0] sm:$0xff] }
  0x36   :  { %3157 = vst [vmem:[#allocation39_spill] sm:$0xff] %v1745_v62  ;;  %203 = vadd.xlane.f32.xlu0 %v202_v42  ;;  %v1766_v42 = vld [vmem:[#allocation2 + $0x250] sm:$0xff]  ;;  %v242_v27 = vadd.f32 %v241_v52, %v1775_v49 }
  0x37   :  { %3158 = vst [vmem:[#allocation40_spill] sm:$0xff] %v1747_v3  ;;  %v236_v44 = vadd.f32 %v235_v25, %v1766_v42  ;;  %v1779_v3 = vld [vmem:[#allocation2 + $0x2c8] sm:$0xff]  ;;  %v1791_v25 = vld [vmem:[#allocation2 + $0x280] sm:$0xff]  ;;  %v1800_v62 = vld [vmem:[#allocation2 + $0x2d0] sm:$0xff] }
  0x38   :  { %3159 = vst [vmem:[#allocation41_spill] sm:$0xff] %v1749_v21  ;;  %v1777_v21 = vld [vmem:[#allocation2 + $0x2c0] sm:$0xff] }
  0x39   :  { %3160 = vst [vmem:[#allocation42_spill] sm:$0xff] %v1752_v29  ;;  %v1785_v29 = vld [vmem:[#allocation2 + $0x2a8] sm:$0xff] }
  0x3a   :  { %3161 = vst [vmem:[#allocation43_spill] sm:$0xff] %v1755_v10  ;;  %v250_v10 = vadd.f32 %v1785_v29, %v1783_v24 }
  0x3b   :  { %3162 = vst [vmem:[#allocation44_spill] sm:$0xff] %v1757_v32  ;;  %228 = vadd.xlane.f32.xlu2 %v227_v34  ;;  %v231_v34 = vadd.f32 %v230_v8, %v1771_v58  ;;  %v1788_v32 = vld [vmem:[#allocation2 + $0x238] sm:$0xff] }
  0x3c   :  { %3163 = vst [vmem:[#allocation45_spill] sm:$0xff] %v1764_v55  ;;  %223 = vadd.xlane.f32.xlu1 %v222_v35  ;;  %v1793_v35 = vld [vmem:[#allocation2 + $0x288] sm:$0xff]  ;;  %v255_v55 = vadd.f32 %v1779_v3, %v1777_v21 }
  0x3d   :  { %3164 = vst [vmem:[#allocation46_spill] sm:$0xff] %v1766_v42  ;;  %v237_v42 = vadd.f32 %v236_v44, %v1781_v51  ;;  %v232_v8 = vadd.f32 %v231_v34, %v1788_v32  ;;  %v245_v52 = vadd.f32 %v1793_v35, %v1791_v25 }
  0x3e   :  { %3165 = vst [vmem:[#allocation47_spill] sm:$0xff] %v1771_v58  ;;  %218 = vadd.xlane.f32.xlu0 %v217_v47  ;;  %v1802_v47 = vld [vmem:[#allocation2 + $0x2b0] sm:$0xff]  ;;  %v256_v58 = vadd.f32 %v255_v55, %v1800_v62 }
  0x3f   :  { %3166 = vst [vmem:[#allocation48_spill] sm:$0xff] %v1775_v49  ;;  %v1807_v49 = vld [vmem:[#allocation2 + $0x290] sm:$0xff]  ;;  %v251_v44 = vadd.f32 %v250_v10, %v1802_v47 }
  0x40   :  { %3167 = vst [vmem:[#allocation49_spill] sm:$0xff] %v1777_v21  ;;  %v1813_v21 = vld [vmem:[#allocation2 + $0x2b8] sm:$0xff] }
  0x41   :  { %3168 = vst [vmem:[#allocation50_spill] sm:$0xff] %v1779_v3  ;;  %v1811_v3 = vld [vmem:[#allocation2 + $0x2d8] sm:$0xff]  ;;  %v252_v55 = vadd.f32 %v251_v44, %v1813_v21 }
  0x42   :  { %3169 = vst [vmem:[#allocation51_spill] sm:$0xff] %v1783_v24  ;;  %v1816_v24 = vld [vmem:[#allocation2 + $0x298] sm:$0xff]  ;;  %v257_v34 = vadd.f32 %v256_v58, %v1811_v3 }
  0x43   :  { %3170 = vst [vmem:[#allocation52_spill] sm:$0xff] %v1785_v29  ;;  %243 = vadd.xlane.f32.xlu2 %v242_v27  ;;  %v246_v29 = vadd.f32 %v245_v52, %v1807_v49  ;;  %v1821_v27 = vld [vmem:[#allocation2 + $0x2e8] sm:$0xff]  ;;  %v1830_v52 = vld [vmem:[#allocation2 + $0x2f8] sm:$0xff] }
  0x44   :  { %3171 = vst [vmem:[#allocation53_spill] sm:$0xff] %v1793_v35  ;;  %238 = vadd.xlane.f32.xlu1 %v237_v42  ;;  %v1819_v35 = vld [vmem:[#allocation2 + $0x2e0] sm:$0xff] }
  0x45   :  { %3172 = vst [vmem:[#allocation54_spill] sm:$0xff] %v1800_v62  ;;  %v247_v42 = vadd.f32 %v246_v29, %v1816_v24  ;;  %v260_v10 = vadd.f32 %v1821_v27, %v1819_v35  ;;  %v1827_v62 = vld [vmem:[#allocation2 + $0x2f0] sm:$0xff] }
  0x46   :  { %3173 = vst [vmem:[#allocation55_spill] sm:$0xff] %v1807_v49  ;;  %233 = vadd.xlane.f32.xlu0 %v232_v8 }
  0x47   :  { %3174 = vst [vmem:[#allocation56_spill] sm:$0xff] %v1811_v3  ;;  %v261_v8 = vadd.f32 %v260_v10, %v1827_v62 }
  0x48   :  { %3175 = vst [vmem:[#allocation57_spill] sm:$0xff] %v1813_v21 }
  0x49   :  { %3176 = vst [vmem:[#allocation58_spill] sm:$0xff] %v1821_v27  ;;  %v262_v58 = vadd.f32 %v261_v8, %v1830_v52 }
  0x4b   :  { %258 = vadd.xlane.f32.xlu2 %v257_v34 }
  0x4c   :  { %253 = vadd.xlane.f32.xlu1 %v252_v55 }
  0x4e   :  { %248 = vadd.xlane.f32.xlu0 %v247_v42 }
  0x56   :  { %263 = vadd.xlane.f32.xlu0 %v262_v58 }
  0x86   :  { %v169_v3 = vpop.xlane.xlu2 %168 }
  0x87   :  { %v279_v49 = vmul.f32 0.001953125, %v169_v3  ;;  %v159_v44 = vpop.xlane.xlu1 %158 }
  0x88   :  { %v277_v21 = vmul.f32 0.001953125, %v159_v44 }
  0x89   :  { %v1834_v29 = vsub.f32 %v1529_v0, %v279_v49  ;;  %v1837_v34 = vsub.f32 %v1531_v1, %v279_v49  ;;  %v149_v27 = vpop.xlane.xlu0 %148  ;;  %v1840_v55 = vsub.f32 %v1533_v2, %v279_v49  ;;  %v1855_v1 = vsub.f32 %v1541_v6, %v279_v49 }
  0x8a   :  { %v1843_v42 = vsub.f32 %v1537_v4, %v277_v21  ;;  %v1846_v10 = vsub.f32 %v1539_v5, %v277_v21  ;;  %v275_v8 = vmul.f32 0.001953125, %v149_v27  ;;  %v1849_v3 = vsub.f32 %v1543_v7, %v277_v21 }
  0x8b   :  { %3177 = vst [vmem:[#allocation59_spill] sm:$0xff] %v1834_v29  ;;  %v1852_v0 = vsub.f32 %v1550_v11, %v277_v21  ;;  %v416_v2 = vmul.f32 %v1834_v29, %v1834_v29  ;;  %v417_v49 = vmul.f32 %v1837_v34, %v1837_v34  ;;  %v1893_v29 = vmul.f32 %v1855_v1, %v1855_v1 }
  0x8c   :  { %3178 = vst [vmem:[#allocation60_spill] sm:$0xff] %v1837_v34  ;;  %v1860_v58 = vsub.f32 %v1547_v9, %v275_v8  ;;  %v1863_v4 = vsub.f32 %v1552_v12, %v275_v8  ;;  %v408_v5 = vmul.f32 %v1843_v42, %v1843_v42  ;;  %v409_v7 = vmul.f32 %v1846_v10, %v1846_v10 }
  0x8d   :  { %3179 = vst [vmem:[#allocation61_spill] sm:$0xff] %v1840_v55  ;;  %v1870_v11 = vsub.f32 %v1554_v13, %v275_v8  ;;  %v1873_v6 = vsub.f32 %v1566_v20, %v275_v8  ;;  %v1879_v9 = vmul.f32 %v1840_v55, %v1840_v55  ;;  %v410_v21 = vmul.f32 %v1849_v3, %v1849_v3 }
  0x8e   :  { %3180 = vst [vmem:[#allocation62_spill] sm:$0xff] %v1843_v42  ;;  %v174_v12 = vpop.xlane.xlu2 %173  ;;  %v510_v27 = vadd.f32 %v409_v7, %v408_v5  ;;  %v400_v44 = vmul.f32 %v1860_v58, %v1860_v58  ;;  %v401_v13 = vmul.f32 %v1863_v4, %v1863_v4  ;;  %v411_v34 = vmul.f32 %v1852_v0, %v1852_v0 }
  0x8f   :  { %3181 = vst [vmem:[#allocation63_spill] sm:$0xff] %v1846_v10  ;;  %v280_v20 = vmul.f32 0.001953125, %v174_v12  ;;  %v164_v8 = vpop.xlane.xlu1 %163  ;;  %v402_v55 = vmul.f32 %v1870_v11, %v1870_v11  ;;  %v403_v7 = vmul.f32 %v1873_v6, %v1873_v6 }
  0x90   :  { %3182 = vst [vmem:[#allocation64_spill] sm:$0xff] %v1849_v3  ;;  %v278_v3 = vmul.f32 0.001953125, %v164_v8  ;;  %v511_v5 = vadd.f32 %v510_v27, %v410_v21  ;;  %v500_v10 = vadd.f32 %v401_v13, %v400_v44 }
  0x91   :  { %3183 = vst [vmem:[#allocation65_spill] sm:$0xff] %v1852_v0  ;;  %v1898_v42 = vsub.f32 %v1559_v16, %v280_v20  ;;  %v1901_v12 = vsub.f32 %v1561_v17, %v280_v20  ;;  %v154_v0 = vpop.xlane.xlu0 %153 }
  0x92   :  { %3184 = vst [vmem:[#allocation66_spill] sm:$0xff] %v1855_v1  ;;  %v1910_v8 = vsub.f32 %v1570_v22, %v278_v3  ;;  %v1913_v21 = vsub.f32 %v1572_v23, %v278_v3  ;;  %v276_v27 = vmul.f32 0.001953125, %v154_v0  ;;  %v512_v44 = vadd.f32 %v511_v5, %v411_v34 }
  0x93   :  { %3185 = vst [vmem:[#allocation67_spill] sm:$0xff] %v1863_v4  ;;  %v1904_v4 = vsub.f32 %v1563_v18, %v280_v20  ;;  %v501_v16 = vadd.f32 %v500_v10, %v402_v55  ;;  %v420_v17 = vmul.f32 %v1898_v42, %v1898_v42  ;;  %v421_v13 = vmul.f32 %v1901_v12, %v1901_v12 }
  0x94   :  { %3186 = vst [vmem:[#allocation68_spill] sm:$0xff] %v1870_v11  ;;  %v1907_v11 = vsub.f32 %v1588_v33, %v280_v20  ;;  %v1922_v33 = vsub.f32 %v1580_v28, %v276_v27  ;;  %v1925_v22 = vsub.f32 %v1583_v30, %v276_v27  ;;  %513 = vadd.xlane.f32.xlu0 %v512_v44 }
  0x95   :  { %v422_v18 = vmul.f32 %v1904_v4, %v1904_v4  ;;  %v1930_v34 = vsub.f32 %v1576_v26, %v278_v3  ;;  %v502_v55 = vadd.f32 %v501_v16, %v403_v7  ;;  %v525_v10 = vadd.f32 %v421_v13, %v420_v17 }
  0x96   :  { %v423_v23 = vmul.f32 %v1907_v11, %v1907_v11  ;;  %v1933_v0 = vsub.f32 %v1597_v38, %v278_v3  ;;  %v412_v20 = vmul.f32 %v1910_v8, %v1910_v8  ;;  %v189_v28 = vpop.xlane.xlu2 %188  ;;  %v413_v30 = vmul.f32 %v1913_v21, %v1913_v21 }
  0x97   :  { %v1940_v5 = vsub.f32 %v1585_v31, %v276_v27  ;;  %v1943_v44 = vsub.f32 %v1605_v43, %v276_v27  ;;  %v520_v26 = vadd.f32 %v417_v49, %v416_v2  ;;  %503 = vadd.xlane.f32.xlu1 %v502_v55  ;;  %v283_v7 = vmul.f32 0.001953125, %v189_v28  ;;  %v184_v16 = vpop.xlane.xlu1 %183 }
  0x98   :  { %v526_v17 = vadd.f32 %v525_v10, %v422_v18  ;;  %v414_v38 = vmul.f32 %v1930_v34, %v1930_v34  ;;  %v404_v3 = vmul.f32 %v1922_v33, %v1922_v33  ;;  %v282_v13 = vmul.f32 0.001953125, %v184_v16 }
  0x99   :  { %v415_v1 = vmul.f32 %v1933_v0, %v1933_v0  ;;  %v515_v31 = vadd.f32 %v413_v30, %v412_v20  ;;  %v405_v43 = vmul.f32 %v1925_v22, %v1925_v22  ;;  %v1954_v2 = vsub.f32 %v1593_v36, %v283_v7  ;;  %v179_v27 = vpop.xlane.xlu0 %178 }
  0x9a   :  { %v1957_v49 = vsub.f32 %v1595_v37, %v283_v7  ;;  %v527_v18 = vadd.f32 %v526_v17, %v423_v23  ;;  %v406_v55 = vmul.f32 %v1940_v5, %v1940_v5  ;;  %v1962_v10 = vsub.f32 %v1599_v39, %v282_v13 }
  0x9b   :  { %v281_v28 = vmul.f32 0.001953125, %v179_v27  ;;  %v516_v16 = vadd.f32 %v515_v31, %v414_v38  ;;  %v407_v20 = vmul.f32 %v1943_v44, %v1943_v44  ;;  %v505_v30 = vadd.f32 %v405_v43, %v404_v3 }
  0x9c   :  { %3187 = vst [vmem:[#allocation69_spill] sm:$0xff] %v1962_v10  ;;  %v1967_v36 = vsub.f32 %v1614_v48, %v283_v7  ;;  %v1970_v37 = vsub.f32 %v1630_v57, %v283_v7  ;;  %v432_v23 = vmul.f32 %v1954_v2, %v1954_v2  ;;  %528 = vadd.xlane.f32.xlu0 %v527_v18 }
  0x9d   :  { %v1975_v17 = vsub.f32 %v1609_v45, %v281_v28  ;;  %v1978_v39 = vsub.f32 %v1611_v46, %v281_v28  ;;  %v517_v38 = vadd.f32 %v516_v16, %v415_v1  ;;  %v433_v3 = vmul.f32 %v1957_v49, %v1957_v49 }
  0x9e   :  { %v506_v31 = vadd.f32 %v505_v30, %v406_v55  ;;  %v434_v48 = vmul.f32 %v1967_v36, %v1967_v36  ;;  %v435_v57 = vmul.f32 %v1970_v37, %v1970_v37  ;;  %v521_v7 = vadd.f32 %v520_v26, %v1879_v9  ;;  %v199_v43 = vpop.xlane.xlu2 %198 }
  0x9f   :  { %v540_v45 = vadd.f32 %v433_v3, %v432_v23  ;;  %v1988_v27 = vsub.f32 %v1628_v56, %v281_v28  ;;  %v1991_v46 = vsub.f32 %v1647_v14, %v281_v28  ;;  %v424_v1 = vmul.f32 %v1975_v17, %v1975_v17  ;;  %518 = vadd.xlane.f32.xlu1 %v517_v38  ;;  %v274_v16 = vpop.xlane.xlu1 %273 }
  0xa0   :  { %v1996_v18 = vsub.f32 %v1601_v40, %v282_v13  ;;  %v507_v55 = vadd.f32 %v506_v31, %v407_v20  ;;  %v285_v30 = vmul.f32 0.001953125, %v199_v43  ;;  %v425_v9 = vmul.f32 %v1978_v39, %v1978_v39 }
  0xa1   :  { %v2000_v26 = vmul.f32 0.001953125, %v274_v16  ;;  %v541_v56 = vadd.f32 %v540_v45, %v434_v48  ;;  %v522_v23 = vadd.f32 %v521_v7, %v1893_v29  ;;  %v194_v14 = vpop.xlane.xlu0 %193  ;;  %v426_v28 = vmul.f32 %v1988_v27, %v1988_v27 }
  0xa2   :  { %3188 = vst [vmem:[#allocation70_spill] sm:$0xff] %v1996_v18  ;;  %508 = vadd.xlane.f32.xlu2 %v507_v55  ;;  %v427_v40 = vmul.f32 %v1991_v46, %v1991_v46  ;;  %v530_v38 = vadd.f32 %v425_v9, %v424_v1  ;;  %v2008_v20 = vsub.f32 %v1618_v50, %v282_v13  ;;  %v284_v3 = vmul.f32 0.001953125, %v194_v14  ;;  %v3199_v9 = vld [vmem:[#allocation12_spill] sm:$0xff] }
  0xa3   :  { %v2011_v31 = vsub.f32 %v1633_v59, %v285_v30  ;;  %v2014_v48 = vsub.f32 %v1635_v60, %v285_v30  ;;  %v542_v29 = vadd.f32 %v541_v56, %v435_v57  ;;  %v2017_v43 = vsub.f32 %v1637_v61, %v282_v13 }
  0xa4   :  { %3189 = vst [vmem:[#allocation71_spill] sm:$0xff] %v2008_v20  ;;  %v531_v7 = vadd.f32 %v530_v38, %v426_v28  ;;  %v428_v45 = vmul.f32 %v1962_v10, %v1962_v10  ;;  %v429_v1 = vmul.f32 %v1996_v18, %v1996_v18  ;;  %v2025_v50 = vsub.f32 %v1623_v53, %v2000_v26 }
  0xa5   :  { %3190 = vst [vmem:[#allocation72_spill] sm:$0xff] %v2011_v31  ;;  %v2028_v59 = vsub.f32 %v1649_v15, %v284_v3  ;;  %v2031_v60 = vsub.f32 %v1651_v19, %v284_v3  ;;  %543 = vadd.xlane.f32.xlu0 %v542_v29  ;;  %v2034_v61 = vsub.f32 %v1665_v41, %v284_v3 }
  0xa6   :  { %3191 = vst [vmem:[#allocation73_spill] sm:$0xff] %v2014_v48  ;;  %v532_v13 = vadd.f32 %v531_v7, %v427_v40  ;;  %v430_v57 = vmul.f32 %v2008_v20, %v2008_v20  ;;  %v535_v55 = vadd.f32 %v429_v1, %v428_v45  ;;  %v2039_v16 = vsub.f32 %v1681_v63, %v284_v3  ;;  %v214_v15 = vpop.xlane.xlu2 %213  ;;  %v3201_v1 = vld [vmem:[#allocation15_spill] sm:$0xff] }
  0xa7   :  { %3192 = vst [vmem:[#allocation74_spill] sm:$0xff] %v2017_v43  ;;  %v2043_v53 = vsub.f32 %v1625_v54, %v2000_v26  ;;  %v436_v19 = vmul.f32 %v2028_v59, %v2028_v59  ;;  %v437_v41 = vmul.f32 %v2031_v60, %v2031_v60  ;;  %v2050_v56 = vsub.f32 %v3199_v9, %v285_v30  ;;  %v209_v14 = vpop.xlane.xlu1 %208 }
  0xa8   :  { %3193 = vst [vmem:[#allocation75_spill] sm:$0xff] %v2025_v50  ;;  %533 = vadd.xlane.f32.xlu1 %v532_v13  ;;  %v288_v28 = vmul.f32 0.001953125, %v214_v15  ;;  %v431_v63 = vmul.f32 %v2017_v43, %v2017_v43  ;;  %v536_v40 = vadd.f32 %v535_v55, %v430_v57  ;;  %v438_v54 = vmul.f32 %v2034_v61, %v2034_v61  ;;  %v3203_v57 = vld [vmem:[#allocation14_spill] sm:$0xff]  ;;  %v3215_v43 = vld [vmem:[#allocation19_spill] sm:$0xff] }
  0xa9   :  { %3194 = vst [vmem:[#allocation76_spill] sm:$0xff] %v2028_v59  ;;  %v287_v38 = vmul.f32 0.001953125, %v209_v14  ;;  %v545_v3 = vadd.f32 %v437_v41, %v436_v19  ;;  %v440_v29 = vmul.f32 %v2011_v31, %v2011_v31  ;;  %v441_v7 = vmul.f32 %v2014_v48, %v2014_v48  ;;  %v204_v45 = vpop.xlane.xlu0 %203  ;;  %v3205_v41 = vld [vmem:[#allocation17_spill] sm:$0xff]  ;;  %v3207_v14 = vld [vmem:[#allocation18_spill] sm:$0xff] }
  0xaa   :  { %3195 = vst [vmem:[#allocation77_spill] sm:$0xff] %v2031_v60  ;;  %523 = vadd.xlane.f32.xlu2 %v522_v23  ;;  %v2061_v13 = vsub.f32 %v3201_v1, %v288_v28  ;;  %v439_v15 = vmul.f32 %v2039_v16, %v2039_v16  ;;  %v2066_v55 = vsub.f32 %v3203_v57, %v285_v30  ;;  %v286_v23 = vmul.f32 0.001953125, %v204_v45  ;;  %v3211_v59 = vld [vmem:[#allocation22_spill] sm:$0xff]  ;;  %v3213_v30 = vld [vmem:[#allocation27_spill] sm:$0xff] }
  0xab   :  { %3196 = vst [vmem:[#allocation78_spill] sm:$0xff] %v2034_v61  ;;  %v442_v19 = vmul.f32 %v2050_v56, %v2050_v56  ;;  %v2071_v9 = vsub.f32 %v3205_v41, %v287_v38  ;;  %v2074_v31 = vsub.f32 %v3207_v14, %v287_v38  ;;  %v546_v48 = vadd.f32 %v545_v3, %v438_v54  ;;  %v3209_v61 = vld [vmem:[#allocation16_spill] sm:$0xff] }
  0xac   :  { %3197 = vst [vmem:[#allocation79_spill] sm:$0xff] %v2039_v16  ;;  %v2077_v1 = vsub.f32 %v3209_v61, %v288_v28  ;;  %v550_v60 = vadd.f32 %v441_v7, %v440_v29  ;;  %v2080_v16 = vsub.f32 %v3211_v59, %v287_v38  ;;  %v2083_v57 = vsub.f32 %v3213_v30, %v287_v38  ;;  %v3217_v41 = vld [vmem:[#allocation20_spill] sm:$0xff]  ;;  %v3219_v7 = vld [vmem:[#allocation23_spill] sm:$0xff] }
  0xad   :  { %3198 = vst [vmem:[#allocation80_spill] sm:$0xff] %v2043_v53  ;;  %v2089_v20 = vsub.f32 %v3217_v41, %v286_v23  ;;  %v547_v14 = vadd.f32 %v546_v48, %v439_v15  ;;  %v448_v54 = vmul.f32 %v2071_v9, %v2071_v9  ;;  %v537_v3 = vadd.f32 %v536_v40, %v431_v63  ;;  %v3223_v41 = vld [vmem:[#allocation21_spill] sm:$0xff] }
  0xae   :  { %3200 = vst [vmem:[#allocation12_spill] sm:$0xff] %v2050_v56  ;;  %v2086_v56 = vsub.f32 %v3215_v43, %v286_v23  ;;  %v443_v61 = vmul.f32 %v2066_v55, %v2066_v55  ;;  %v551_v29 = vadd.f32 %v550_v60, %v442_v19  ;;  %v449_v59 = vmul.f32 %v2074_v31, %v2074_v31  ;;  %v229_v38 = vpop.xlane.xlu2 %228  ;;  %v3221_v43 = vld [vmem:[#allocation30_spill] sm:$0xff] }
  0xaf   :  { %3202 = vst [vmem:[#allocation15_spill] sm:$0xff] %v2061_v13  ;;  %v2098_v45 = vsub.f32 %v3219_v7, %v286_v23  ;;  %v2101_v30 = vsub.f32 %v3221_v43, %v286_v23  ;;  %v445_v63 = vmul.f32 %v2089_v20, %v2089_v20  ;;  %v224_v40 = vpop.xlane.xlu1 %223  ;;  %v450_v60 = vmul.f32 %v2080_v16, %v2080_v16 }
  0xb0   :  { %3204 = vst [vmem:[#allocation14_spill] sm:$0xff] %v2066_v55  ;;  %v444_v48 = vmul.f32 %v2086_v56, %v2086_v56  ;;  %548 = vadd.xlane.f32.xlu1 %v547_v14  ;;  %v451_v15 = vmul.f32 %v2083_v57, %v2083_v57  ;;  %v560_v19 = vadd.f32 %v449_v59, %v448_v54  ;;  %v290_v23 = vmul.f32 0.001953125, %v224_v40  ;;  %v3225_v55 = vld [vmem:[#allocation24_spill] sm:$0xff] }
  0xb1   :  { %3206 = vst [vmem:[#allocation17_spill] sm:$0xff] %v2071_v9  ;;  %v2112_v7 = vsub.f32 %v3223_v41, %v288_v28  ;;  %v291_v43 = vmul.f32 0.001953125, %v229_v38  ;;  %v552_v14 = vadd.f32 %v551_v29, %v443_v61  ;;  %v2119_v18 = vsub.f32 %v3225_v55, %v288_v28  ;;  %v3227_v54 = vld [vmem:[#allocation28_spill] sm:$0xff]  ;;  %v3229_v41 = vld [vmem:[#allocation29_spill] sm:$0xff]  ;;  %v3231_v28 = vld [vmem:[#allocation31_spill] sm:$0xff] }
  0xb2   :  { %3208 = vst [vmem:[#allocation18_spill] sm:$0xff] %v2074_v31  ;;  %v555_v31 = vadd.f32 %v445_v63, %v444_v48  ;;  %538 = vadd.xlane.f32.xlu2 %v537_v3  ;;  %v561_v9 = vadd.f32 %v560_v19, %v450_v60  ;;  %v2122_v59 = vsub.f32 %v3227_v54, %v290_v23  ;;  %v3233_v48 = vld [vmem:[#allocation32_spill] sm:$0xff]  ;;  %v3235_v60 = vld [vmem:[#allocation25_spill] sm:$0xff] }
  0xb3   :  { %3210 = vst [vmem:[#allocation16_spill] sm:$0xff] %v2077_v1  ;;  %v2125_v40 = vsub.f32 %v3229_v41, %v290_v23  ;;  %v452_v3 = vmul.f32 %v2061_v13, %v2061_v13  ;;  %v453_v61 = vmul.f32 %v2077_v1, %v2077_v1  ;;  %v454_v29 = vmul.f32 %v2112_v7, %v2112_v7 }
  0xb4   :  { %3212 = vst [vmem:[#allocation22_spill] sm:$0xff] %v2080_v16  ;;  %v447_v16 = vmul.f32 %v2101_v30, %v2101_v30  ;;  %v2140_v19 = vsub.f32 %v3235_v60, %v291_v43  ;;  %v460_v41 = vmul.f32 %v2122_v59, %v2122_v59  ;;  %v455_v60 = vmul.f32 %v2119_v18, %v2119_v18 }
  0xb5   :  { %3214 = vst [vmem:[#allocation27_spill] sm:$0xff] %v2083_v57 }
  0xb6   :  { %3216 = vst [vmem:[#allocation19_spill] sm:$0xff] %v2086_v56  ;;  %v446_v56 = vmul.f32 %v2098_v45, %v2098_v45 }
  0xb7   :  { %3218 = vst [vmem:[#allocation20_spill] sm:$0xff] %v2089_v20  ;;  %v219_v20 = vpop.xlane.xlu0 %218 }
  0xb8   :  { %3220 = vst [vmem:[#allocation23_spill] sm:$0xff] %v2098_v45  ;;  %v289_v38 = vmul.f32 0.001953125, %v219_v20  ;;  %v556_v57 = vadd.f32 %v555_v31, %v446_v56  ;;  %v562_v45 = vadd.f32 %v561_v9, %v451_v15  ;;  %v565_v31 = vadd.f32 %v453_v61, %v452_v3  ;;  %v3236_v56 = vld [vmem:[#allocation34_spill] sm:$0xff]  ;;  %v3238_v15 = vld [vmem:[#allocation39_spill] sm:$0xff] }
  0xb9   :  { %3222 = vst [vmem:[#allocation30_spill] sm:$0xff] %v2101_v30  ;;  %v2143_v9 = vsub.f32 %v3236_v56, %v290_v23  ;;  %v2146_v54 = vsub.f32 %v3238_v15, %v290_v23  ;;  %v239_v23 = vpop.xlane.xlu1 %238  ;;  %v3244_v15 = vld [vmem:[#allocation42_spill] sm:$0xff] }
  0xba   :  { %3224 = vst [vmem:[#allocation21_spill] sm:$0xff] %v2112_v7  ;;  %v2134_v55 = vsub.f32 %v3231_v28, %v289_v38  ;;  %v2137_v63 = vsub.f32 %v3233_v48, %v289_v38  ;;  %v557_v20 = vadd.f32 %v556_v57, %v447_v16  ;;  %v3240_v7 = vld [vmem:[#allocation26_spill] sm:$0xff]  ;;  %v244_v48 = vpop.xlane.xlu2 %243  ;;  %v461_v16 = vmul.f32 %v2125_v40, %v2125_v40  ;;  %v3242_v57 = vld [vmem:[#allocation35_spill] sm:$0xff] }
  0xbb   :  { %3226 = vst [vmem:[#allocation24_spill] sm:$0xff] %v2119_v18  ;;  %v2151_v28 = vsub.f32 %v3240_v7, %v291_v43  ;;  %v2158_v3 = vsub.f32 %v3242_v57, %v289_v38  ;;  %563 = vadd.xlane.f32.xlu1 %v562_v45  ;;  %v2160_v61 = vmul.f32 0.001953125, %v244_v48  ;;  %v566_v56 = vadd.f32 %v565_v31, %v454_v29  ;;  %v3245_v48 = vld [vmem:[#allocation37_spill] sm:$0xff] }
  0xbc   :  { %3228 = vst [vmem:[#allocation28_spill] sm:$0xff] %v2122_v59  ;;  %558 = vadd.xlane.f32.xlu0 %v557_v20  ;;  %v2163_v59 = vsub.f32 %v3244_v15, %v289_v38  ;;  %v456_v7 = vmul.f32 %v2134_v55, %v2134_v55  ;;  %v293_v20 = vmul.f32 0.001953125, %v239_v23  ;;  %v462_v18 = vmul.f32 %v2143_v9, %v2143_v9  ;;  %v3247_v38 = vld [vmem:[#allocation38_spill] sm:$0xff]  ;;  %v3251_v15 = vld [vmem:[#allocation41_spill] sm:$0xff] }
  0xbd   :  { %3230 = vst [vmem:[#allocation29_spill] sm:$0xff] %v2125_v40  ;;  %v575_v1 = vadd.f32 %v461_v16, %v460_v41  ;;  %v457_v57 = vmul.f32 %v2137_v63, %v2137_v63  ;;  %553 = vadd.xlane.f32.xlu2 %v552_v14  ;;  %v2173_v40 = vsub.f32 %v3245_v48, %v2160_v61  ;;  %v3249_v41 = vld [vmem:[#allocation40_spill] sm:$0xff] }
  0xbe   :  { %3232 = vst [vmem:[#allocation31_spill] sm:$0xff] %v2134_v55  ;;  %v2177_v29 = vsub.f32 %v3247_v38, %v2160_v61  ;;  %v463_v31 = vmul.f32 %v2146_v54, %v2146_v54  ;;  %v458_v23 = vmul.f32 %v2158_v3, %v2158_v3  ;;  %v2184_v16 = vsub.f32 %v3249_v41, %v293_v20  ;;  %v3254_v38 = vld [vmem:[#allocation36_spill] sm:$0xff] }
  0xbf   :  { %3234 = vst [vmem:[#allocation32_spill] sm:$0xff] %v2137_v63  ;;  %v234_v45 = vpop.xlane.xlu0 %233  ;;  %v2187_v14 = vsub.f32 %v3251_v15, %v293_v20  ;;  %v576_v55 = vadd.f32 %v575_v1, %v462_v18  ;;  %v570_v48 = vadd.f32 %v457_v57, %v456_v7  ;;  %v2193_v30 = vsub.f32 %v3254_v38, %v291_v43 }
  0xc0   :  { %3237 = vst [vmem:[#allocation25_spill] sm:$0xff] %v2143_v9  ;;  %v292_v63 = vmul.f32 0.001953125, %v234_v45  ;;  %v3252_v9 = vld [vmem:[#allocation33_spill] sm:$0xff]  ;;  %v567_v10 = vadd.f32 %v566_v56, %v455_v60  ;;  %v459_v41 = vmul.f32 %v2163_v59, %v2163_v59  ;;  %v465_v15 = vmul.f32 %v2151_v28, %v2151_v28  ;;  %v3255_v45 = vld [vmem:[#allocation43_spill] sm:$0xff] }
  0xc1   :  { %3239 = vst [vmem:[#allocation34_spill] sm:$0xff] %v2146_v54  ;;  %v2190_v13 = vsub.f32 %v3252_v9, %v291_v43  ;;  %v464_v54 = vmul.f32 %v2140_v19, %v2140_v19  ;;  %v571_v1 = vadd.f32 %v570_v48, %v458_v23  ;;  %v3256_v43 = vld [vmem:[#allocation46_spill] sm:$0xff]  ;;  %v472_v60 = vmul.f32 %v2184_v16, %v2184_v16  ;;  %v254_v48 = vpop.xlane.xlu1 %253 }
  0xc2   :  { %3241 = vst [vmem:[#allocation39_spill] sm:$0xff] %v2151_v28  ;;  %v2202_v18 = vsub.f32 %v3255_v45, %v292_v63  ;;  %v2207_v7 = vsub.f32 %v3256_v43, %v293_v20  ;;  %v259_v57 = vpop.xlane.xlu2 %258  ;;  %v473_v56 = vmul.f32 %v2187_v14, %v2187_v14  ;;  %v467_v43 = vmul.f32 %v2193_v30, %v2193_v30 }
  0xc3   :  { %3243 = vst [vmem:[#allocation26_spill] sm:$0xff] %v2158_v3  ;;  %v577_v3 = vadd.f32 %v576_v55, %v463_v31  ;;  %v466_v9 = vmul.f32 %v2190_v13, %v2190_v13  ;;  %v580_v38 = vadd.f32 %v465_v15, %v464_v54  ;;  %v2210_v55 = vsub.f32 %v1781_v51, %v293_v20  ;;  %v3258_v31 = vld [vmem:[#allocation44_spill] sm:$0xff]  ;;  %v3260_v20 = vld [vmem:[#allocation47_spill] sm:$0xff] }
  0xc4   :  { %3246 = vst [vmem:[#allocation35_spill] sm:$0xff] %v2173_v40  ;;  %v2217_v45 = vsub.f32 %v3258_v31, %v292_v63  ;;  %v572_v23 = vadd.f32 %v571_v1, %v459_v41  ;;  %v296_v54 = vmul.f32 0.001953125, %v254_v48  ;;  %v590_v51 = vadd.f32 %v473_v56, %v472_v60  ;;  %v3263_v1 = vld [vmem:[#allocation51_spill] sm:$0xff]  ;;  %v3266_v56 = vld [vmem:[#allocation49_spill] sm:$0xff] }
  0xc5   :  { %3248 = vst [vmem:[#allocation42_spill] sm:$0xff] %v2177_v29  ;;  %578 = vadd.xlane.f32.xlu1 %v577_v3  ;;  %v581_v15 = vadd.f32 %v580_v38, %v466_v9  ;;  %v2222_v28 = vsub.f32 %v3260_v20, %v292_v63  ;;  %568 = vadd.xlane.f32.xlu2 %v567_v10  ;;  %v3264_v9 = vld [vmem:[#allocation52_spill] sm:$0xff] }
  0xc6   :  { %3250 = vst [vmem:[#allocation37_spill] sm:$0xff] %v2184_v16  ;;  %573 = vadd.xlane.f32.xlu0 %v572_v23  ;;  %v474_v31 = vmul.f32 %v2207_v7, %v2207_v7  ;;  %v475_v3 = vmul.f32 %v2210_v55, %v2210_v55  ;;  %v2229_v41 = vsub.f32 %v1788_v32, %v292_v63  ;;  %v3269_v63 = vld [vmem:[#allocation53_spill] sm:$0xff] }
  0xc7   :  { %3253 = vst [vmem:[#allocation38_spill] sm:$0xff] %v2190_v13  ;;  %v297_v13 = vmul.f32 0.001953125, %v259_v57  ;;  %v249_v16 = vpop.xlane.xlu0 %248  ;;  %v2232_v57 = vsub.f32 %v3263_v1, %v296_v54  ;;  %v2235_v38 = vsub.f32 %v3264_v9, %v296_v54  ;;  %v582_v23 = vadd.f32 %v581_v15, %v467_v43  ;;  %v3271_v9 = vld [vmem:[#allocation45_spill] sm:$0xff] }
  0xc8   :  { %3257 = vst [vmem:[#allocation40_spill] sm:$0xff] %v2210_v55  ;;  %v295_v60 = vmul.f32 0.001953125, %v249_v16  ;;  %v591_v48 = vadd.f32 %v590_v51, %v474_v31  ;;  %v468_v20 = vmul.f32 %v2202_v18, %v2202_v18  ;;  %v469_v55 = vmul.f32 %v2217_v45, %v2217_v45 }
  0xc9   :  { %3259 = vst [vmem:[#allocation41_spill] sm:$0xff] %v2217_v45  ;;  %v2238_v10 = vsub.f32 %v3266_v56, %v297_v13  ;;  %v470_v16 = vmul.f32 %v2222_v28, %v2222_v28  ;;  %v2254_v56 = vsub.f32 %v3271_v9, %v2160_v61  ;;  %v471_v15 = vmul.f32 %v2229_v41, %v2229_v41 }
  0xca   :  { %3261 = vst [vmem:[#allocation33_spill] sm:$0xff] %v2222_v28  ;;  %v2245_v32 = vsub.f32 %v1791_v25, %v295_v60  ;;  %v2248_v1 = vsub.f32 %v3269_v63, %v295_v60  ;;  %v592_v43 = vadd.f32 %v591_v48, %v475_v3  ;;  %v585_v51 = vadd.f32 %v469_v55, %v468_v20  ;;  %v3273_v25 = vld [vmem:[#allocation48_spill] sm:$0xff]  ;;  %v3275_v48 = vld [vmem:[#allocation57_spill] sm:$0xff] }
  0xcb   :  { %3262 = vst [vmem:[#allocation36_spill] sm:$0xff] %v2229_v41  ;;  %v476_v31 = vmul.f32 %v2173_v40, %v2173_v40  ;;  %v2262_v45 = vsub.f32 %v3273_v25, %v2160_v61  ;;  %v477_v63 = vmul.f32 %v2177_v29, %v2177_v29  ;;  %v478_v28 = vmul.f32 %v2254_v56, %v2254_v56  ;;  %v3277_v25 = vld [vmem:[#allocation50_spill] sm:$0xff] }
  0xcc   :  { %3265 = vst [vmem:[#allocation43_spill] sm:$0xff] %v2235_v38  ;;  %v2269_v9 = vsub.f32 %v1802_v47, %v296_v54  ;;  %v586_v3 = vadd.f32 %v585_v51, %v470_v16  ;;  %v2272_v55 = vsub.f32 %v3275_v48, %v296_v54  ;;  %v484_v20 = vmul.f32 %v2232_v57, %v2232_v57  ;;  %v3279_v47 = vld [vmem:[#allocation55_spill] sm:$0xff] }
  0xcd   :  { %3267 = vst [vmem:[#allocation46_spill] sm:$0xff] %v2238_v10  ;;  %593 = vadd.xlane.f32.xlu1 %v592_v43  ;;  %v485_v61 = vmul.f32 %v2235_v38, %v2235_v38  ;;  %v2279_v40 = vsub.f32 %v3277_v25, %v297_v13  ;;  %v595_v29 = vadd.f32 %v477_v63, %v476_v31 }
  0xce   :  { %3268 = vst [vmem:[#allocation44_spill] sm:$0xff] %v2245_v32  ;;  %v2284_v41 = vsub.f32 %v3279_v47, %v295_v60  ;;  %583 = vadd.xlane.f32.xlu2 %v582_v23  ;;  %v587_v16 = vadd.f32 %v586_v3, %v471_v15  ;;  %v2287_v51 = vsub.f32 %v1816_v24, %v295_v60  ;;  %v3282_v60 = vld [vmem:[#allocation54_spill] sm:$0xff] }
  0xcf   :  { %3270 = vst [vmem:[#allocation47_spill] sm:$0xff] %v2248_v1  ;;  %v264_v54 = vpop.xlane.xlu0 %263  ;;  %v605_v43 = vadd.f32 %v485_v61, %v484_v20  ;;  %v480_v48 = vmul.f32 %v2245_v32, %v2245_v32  ;;  %v479_v31 = vmul.f32 %v2262_v45, %v2262_v45  ;;  %v596_v63 = vadd.f32 %v595_v29, %v478_v28  ;;  %v3285_v61 = vld [vmem:[#allocation56_spill] sm:$0xff] }
  0xd0   :  { %3272 = vst [vmem:[#allocation51_spill] sm:$0xff] %v2254_v56  ;;  %v486_v56 = vmul.f32 %v2269_v9, %v2269_v9  ;;  %v298_v38 = vmul.f32 0.001953125, %v264_v54  ;;  %v481_v25 = vmul.f32 %v2248_v1, %v2248_v1  ;;  %588 = vadd.xlane.f32.xlu0 %v587_v16  ;;  %v487_v23 = vmul.f32 %v2272_v55, %v2272_v55  ;;  %v3287_v16 = vld [vmem:[#allocation58_spill] sm:$0xff]  ;;  %v3289_v1 = vld [vmem:[#allocation11_spill] sm:$0xff] }
  0xd1   :  { %3274 = vst [vmem:[#allocation52_spill] sm:$0xff] %v2269_v9  ;;  %v482_v24 = vmul.f32 %v2284_v41, %v2284_v41  ;;  %v2300_v3 = vsub.f32 %v3282_v60, %v297_v13  ;;  %v483_v28 = vmul.f32 %v2287_v51, %v2287_v51  ;;  %v2308_v47 = vsub.f32 %v3285_v61, %v297_v13 }
  0xd2   :  { %3276 = vst [vmem:[#allocation49_spill] sm:$0xff] %v2272_v55  ;;  %v606_v15 = vadd.f32 %v605_v43, %v486_v56  ;;  %v2303_v20 = vsub.f32 %v1819_v35, %v298_v38  ;;  %v600_v29 = vadd.f32 %v481_v25, %v480_v48  ;;  %v2311_v54 = vsub.f32 %v3287_v16, %v298_v38  ;;  %v3291_v48 = vld [vmem:[#allocation13_spill] sm:$0xff] }
  0xd3   :  { %3278 = vst [vmem:[#allocation53_spill] sm:$0xff] %v2279_v40  ;;  %v488_v43 = vmul.f32 %v2238_v10, %v2238_v10  ;;  %v489_v60 = vmul.f32 %v2279_v40, %v2279_v40  ;;  %v2319_v32 = vsub.f32 %v3289_v1, %v2000_v26  ;;  %v2323_v13 = vsub.f32 %v3291_v48, %v2000_v26 }
  0xd4   :  { %3280 = vst [vmem:[#allocation45_spill] sm:$0xff] %v2284_v41  ;;  %v607_v56 = vadd.f32 %v606_v15, %v487_v23  ;;  %v597_v41 = vadd.f32 %v596_v63, %v479_v31  ;;  %v601_v35 = vadd.f32 %v600_v29, %v482_v24  ;;  %v490_v25 = vmul.f32 %v2300_v3, %v2300_v3 }
  0xd5   :  { %3281 = vst [vmem:[#allocation48_spill] sm:$0xff] %v2287_v51  ;;  %v610_v23 = vadd.f32 %v489_v60, %v488_v43  ;;  %v496_v15 = vmul.f32 %v2025_v50, %v2025_v50  ;;  %v497_v31 = vmul.f32 %v2043_v53, %v2043_v53  ;;  %v498_v1 = vmul.f32 %v2319_v32, %v2319_v32  ;;  %v3295_v53 = vld [vmem:[#allocation67_spill] sm:$0xff]  ;;  %v3299_v51 = vld [vmem:[#allocation64_spill] sm:$0xff] }
  0xd6   :  { %3283 = vst [vmem:[#allocation57_spill] sm:$0xff] %v2300_v3  ;;  %608 = vadd.xlane.f32.xlu1 %v607_v56  ;;  %v602_v63 = vadd.f32 %v601_v35, %v483_v28  ;;  %v2334_v24 = vsub.f32 %v1827_v62, %v298_v38  ;;  %598 = vadd.xlane.f32.xlu2 %v597_v41 }
  0xd7   :  { %3284 = vst [vmem:[#allocation50_spill] sm:$0xff] %v2303_v20  ;;  %v499_v26 = vmul.f32 %v2323_v13, %v2323_v13  ;;  %v620_v29 = vsel %vm265_vm0, %v496_v15, 0.0  ;;  %v621_v61 = vsel %vm265_vm0, %v497_v31, 0.0  ;;  %v492_v16 = vmul.f32 %v2303_v20, %v2303_v20 }
  0xd8   :  { %3286 = vst [vmem:[#allocation55_spill] sm:$0xff] %v2308_v47  ;;  %v622_v56 = vadd.f32 %v621_v61, %v620_v29  ;;  %v2343_v28 = vsub.f32 %v1830_v52, %v298_v38  ;;  %v493_v43 = vmul.f32 %v2311_v54, %v2311_v54  ;;  %603 = vadd.xlane.f32.xlu0 %v602_v63  ;;  %v623_v60 = vsel %vm265_vm0, %v498_v1, 0.0 }
  0xd9   :  { %3288 = vst [vmem:[#allocation54_spill] sm:$0xff] %v2311_v54  ;;  %v491_v62 = vmul.f32 %v2308_v47, %v2308_v47  ;;  %v611_v41 = vadd.f32 %v610_v23, %v490_v25  ;;  %v494_v48 = vmul.f32 %v2334_v24, %v2334_v24  ;;  %v625_v31 = vsel %vm265_vm0, %v499_v26, 0.0  ;;  %v3296_v47 = vld [vmem:[#allocation68_spill] sm:$0xff] }
  0xda   :  { %3290 = vst [vmem:[#allocation56_spill] sm:$0xff] %v2319_v32  ;;  %v624_v35 = vadd.f32 %v623_v60, %v622_v56  ;;  %v615_v15 = vadd.f32 %v493_v43, %v492_v16  ;;  %v495_v52 = vmul.f32 %v2343_v28, %v2343_v28 }
  0xdb   :  { %3292 = vst [vmem:[#allocation58_spill] sm:$0xff] %v2323_v13  ;;  %v612_v61 = vadd.f32 %v611_v41, %v491_v62 }
  0xdc   :  { %3293 = vst [vmem:[#allocation11_spill] sm:$0xff] %v2334_v24  ;;  %v626_v29 = vadd.f32 %v625_v31, %v624_v35  ;;  %v616_v38 = vadd.f32 %v615_v15, %v494_v48 }
  0xdd   :  { %3294 = vst [vmem:[#allocation13_spill] sm:$0xff] %v2343_v28 }
  0xde   :  { %627 = vadd.xlane.f32.xlu1 %v626_v29  ;;  %v617_v63 = vadd.f32 %v616_v38, %v495_v52  ;;  %613 = vadd.xlane.f32.xlu2 %v612_v61  ;;  %v142_v29 = vld [vmem:[#allocation5] ss:$2 sm:$0xf] }
  0xe0   :  { %618 = vadd.xlane.f32.xlu0 %v617_v63  ;;  %v144_v63 = vld [vmem:[#allocation5 + $0x1] ss:$2 sm:$0xf] }
  0xe1   :  { %v2379_v13 = vperm.slane %v144_v63, 2 }
 0x107   :  { %v514_v23 = vpop.xlane.xlu0 %513 }
 0x108   :  { %v631_v56 = vmul.f32 0.001953125, %v514_v23 }
 0x10a   :  { %v504_v25 = vpop.xlane.xlu1 %503  ;;  %v656_v54 = vadd.f32 1e-06, %v631_v56 }
 0x10b   :  { %v629_v1 = vmul.f32 0.001953125, %v504_v25 }
 0x10c   :  { %vm705_vm5 = vweird.f32 %v656_v54 }
 0x10d   :  { %v654_v60 = vadd.f32 1e-06, %v629_v1  ;;  %v2361_v1 = vperm.slane %v142_v29, 0 }
 0x10f   :  { %1372 = vrsqrt.f32 %v654_v60  ;;  %v529_v23 = vpop.xlane.xlu0 %528  ;;  %vm685_vm2 = vweird.f32 %v654_v60 }
 0x110   :  { %1374 = vrsqrt.f32 %v656_v54 }
 0x112   :  { %v519_v16 = vpop.xlane.xlu1 %518 }
 0x113   :  { %v632_v26 = vmul.f32 0.001953125, %v519_v16  ;;  %v634_v16 = vmul.f32 0.001953125, %v529_v23  ;;  %v2377_v23 = vperm.slane %v144_v63, 1 }
 0x115   :  { %v1373_v43 = vpop.eup %1372  ;;  %v2355_v35 = vadd.f32 1e-06, %v632_v26  ;;  %v509_v31 = vpop.xlane.xlu2 %508  ;;  %v2363_v26 = vperm.slane %v142_v29, 1 }
 0x116   :  { %v1375_v48 = vpop.eup %1374  ;;  %v680_v62 = vmul.f32 %v1373_v43, %v654_v60  ;;  %v630_v41 = vmul.f32 0.001953125, %v509_v31  ;;  %v2365_v31 = vperm.slane %v142_v29, 2  ;;  %vm686_vm1 = vweird.f32 %v1373_v43 }
 0x117   :  { %v700_v15 = vmul.f32 %v1375_v48, %v656_v54  ;;  %1376 = vrsqrt.f32 %v2355_v35  ;;  %vm706_vm3 = vweird.f32 %v1375_v48  ;;  %vm687_vm4 = vmor %vm685_vm2, %vm686_vm1  ;;  %vm715_vm7 = vweird.f32 %v2355_v35 }
 0x118   :  { %v681_v52 = vmul.f32 %v1373_v43, %v680_v62  ;;  %v2358_v38 = vadd.f32 1e-06, %v630_v41  ;;  %v2369_v62 = vperm.slane %v142_v29, 3  ;;  %v2371_v41 = vperm.slane %v144_v63, 0  ;;  %vm707_vm6 = vmor %vm705_vm5, %vm706_vm3 }
 0x119   :  { %v701_v61 = vmul.f32 %v1375_v48, %v700_v15 }
 0x11a   :  { %v682_v25 = vmul.f32 0.5, %v681_v52  ;;  %1378 = vrsqrt.f32 %v2358_v38  ;;  %v2373_v52 = vadd.f32 1e-06, %v634_v16  ;;  %vm695_vm9 = vweird.f32 %v2358_v38 }
 0x11b   :  { %v702_v56 = vmul.f32 0.5, %v701_v61  ;;  %v534_v9 = vpop.xlane.xlu1 %533 }
 0x11c   :  { %v683_v28 = vsub.f32 1.5, %v682_v25  ;;  %1380 = vrsqrt.f32 %v2373_v52  ;;  %vm735_vm14 = vweird.f32 %v2373_v52 }
 0x11d   :  { %v2367_v24 = vpop.eup %1376  ;;  %v703_v15 = vsub.f32 1.5, %v702_v56  ;;  %v524_v29 = vpop.xlane.xlu2 %523  ;;  %v2384_v56 = vperm.slane %v144_v63, 3  ;;  %v3297_v63 = vld [vmem:[#allocation62_spill] sm:$0xff] }
 0x11e   :  { %v684_v20 = vmul.f32 %v1373_v43, %v683_v28  ;;  %v710_v61 = vmul.f32 %v2367_v24, %v2355_v35  ;;  %v633_v54 = vmul.f32 0.001953125, %v524_v29  ;;  %vm716_vm8 = vweird.f32 %v2367_v24 }
 0x11f   :  { %v704_v25 = vmul.f32 %v1375_v48, %v703_v15  ;;  %vm717_vm10 = vmor %vm715_vm7, %vm716_vm8 }
 0x120   :  { %v2382_v32 = vpop.eup %1378  ;;  %v688_v16 = vsel %vm687_vm4, %v1373_v43, %v684_v20  ;;  %v711_v28 = vmul.f32 %v2367_v24, %v710_v61  ;;  %v3298_v61 = vld [vmem:[#allocation63_spill] sm:$0xff] }
 0x121   :  { %v929_v60 = vmul.f32 %v688_v16, %v1860_v58  ;;  %v930_v50 = vmul.f32 %v688_v16, %v3295_v53  ;;  %v931_v3 = vmul.f32 %v688_v16, %v3296_v47  ;;  %v932_v40 = vmul.f32 %v688_v16, %v1873_v6 }
 0x122   :  { %v708_v15 = vsel %vm707_vm6, %v1375_v48, %v704_v25  ;;  %v712_v10 = vmul.f32 0.5, %v711_v28  ;;  %v690_v20 = vmul.f32 %v2382_v32, %v2358_v38  ;;  %v3300_v48 = vld [vmem:[#allocation65_spill] sm:$0xff]  ;;  %v2403_v28 = vpop.eup %1380  ;;  %vm696_vm11 = vweird.f32 %v2382_v32 }
 0x123   :  { %v1038_v43 = vmul.f32 %v2361_v1, %v929_v60  ;;  %v1039_v58 = vmul.f32 %v2363_v26, %v930_v50  ;;  %v1040_v53 = vmul.f32 %v2365_v31, %v931_v3  ;;  %v1041_v47 = vmul.f32 %v2369_v62, %v932_v40  ;;  %vm697_vm13 = vmor %vm695_vm9, %vm696_vm11 }
 0x124   :  { %v937_v6 = vmul.f32 %v708_v15, %v3297_v63  ;;  %v938_v16 = vmul.f32 %v708_v15, %v3298_v61  ;;  %v939_v55 = vmul.f32 %v708_v15, %v3299_v51  ;;  %v940_v25 = vmul.f32 %v708_v15, %v3300_v48 }
 0x125   :  { %v1147_v29 = vadd.f32 %v2371_v41, %v1038_v43  ;;  %v1148_v60 = vadd.f32 %v2377_v23, %v1039_v58  ;;  %v1149_v50 = vadd.f32 %v2379_v13, %v1040_v53  ;;  %v1150_v3 = vadd.f32 %v2384_v56, %v1041_v47 }
 0x126   :  { %v1046_v40 = vmul.f32 %v2361_v1, %v937_v6  ;;  %v1047_v63 = vmul.f32 %v2363_v26, %v938_v16  ;;  %v1048_v61 = vmul.f32 %v2365_v31, %v939_v55  ;;  %v1049_v51 = vmul.f32 %v2369_v62, %v940_v25 }
 0x127   :  { %1247 = vst [vmem:[#allocation7] sm:$0xff] %v1147_v29  ;;  %v713_v15 = vsub.f32 1.5, %v712_v10  ;;  %v691_v43 = vmul.f32 %v2382_v32, %v690_v20  ;;  %v730_v58 = vmul.f32 %v2403_v28, %v2373_v52  ;;  %v2423_v48 = vadd.f32 1e-06, %v633_v54  ;;  %v544_v29 = vpop.xlane.xlu0 %543 }
 0x128   :  { %1248 = vst [vmem:[#allocation7 + $0x8] sm:$0xff] %v1148_v60  ;;  %v1155_v53 = vadd.f32 %v2371_v41, %v1046_v40  ;;  %v1156_v47 = vadd.f32 %v2377_v23, %v1047_v63  ;;  %v1157_v6 = vadd.f32 %v2379_v13, %v1048_v61  ;;  %v1158_v20 = vadd.f32 %v2384_v56, %v1049_v51 }
 0x129   :  { %1249 = vst [vmem:[#allocation7 + $0x10] sm:$0xff] %v1149_v50  ;;  %v714_v55 = vmul.f32 %v2367_v24, %v713_v15  ;;  %v692_v10 = vmul.f32 0.5, %v691_v43  ;;  %v731_v16 = vmul.f32 %v2403_v28, %v730_v58  ;;  %vm736_vm12 = vweird.f32 %v2403_v28  ;;  %v539_v15 = vpop.xlane.xlu2 %538 }
 0x12a   :  { %1250 = vst [vmem:[#allocation7 + $0x18] sm:$0xff] %v1150_v3  ;;  %v635_v25 = vmul.f32 0.001953125, %v534_v9  ;;  %1382 = vrsqrt.f32 %v2423_v48  ;;  %vm737_vm15 = vmor %vm735_vm14, %vm736_vm12  ;;  %vm725_vm1 = vweird.f32 %v2423_v48 }
 0x12b   :  { %1255 = vst [vmem:[#allocation7 + $0x40] sm:$0xff] %v1155_v53  ;;  %v718_v60 = vsel %vm717_vm10, %v2367_v24, %v714_v55  ;;  %v693_v50 = vsub.f32 1.5, %v692_v10  ;;  %v732_v54 = vmul.f32 0.5, %v731_v16  ;;  %v637_v24 = vmul.f32 0.001953125, %v544_v29  ;;  %v549_v10 = vpop.xlane.xlu1 %548 }
 0x12c   :  { %1256 = vst [vmem:[#allocation7 + $0x48] sm:$0xff] %v1156_v47  ;;  %v941_v3 = vmul.f32 %v718_v60, %v1910_v8  ;;  %v942_v40 = vmul.f32 %v718_v60, %v1913_v21  ;;  %v943_v35 = vmul.f32 %v718_v60, %v1930_v34  ;;  %v944_v63 = vmul.f32 %v718_v60, %v1933_v0 }
 0x12d   :  { %1257 = vst [vmem:[#allocation7 + $0x50] sm:$0xff] %v1157_v6  ;;  %v694_v9 = vmul.f32 %v2382_v32, %v693_v50  ;;  %v733_v61 = vsub.f32 1.5, %v732_v54  ;;  %v2439_v51 = vadd.f32 1e-06, %v635_v25  ;;  %v2468_v60 = vadd.f32 1e-06, %v637_v24 }
 0x12e   :  { %1258 = vst [vmem:[#allocation7 + $0x58] sm:$0xff] %v1158_v20  ;;  %v1050_v43 = vmul.f32 %v2361_v1, %v941_v3  ;;  %v1051_v58 = vmul.f32 %v2363_v26, %v942_v40  ;;  %v1052_v8 = vmul.f32 %v2365_v31, %v943_v35  ;;  %v1053_v21 = vmul.f32 %v2369_v62, %v944_v63 }
 0x12f   :  { %v698_v34 = vsel %vm697_vm13, %v2382_v32, %v694_v9  ;;  %v734_v0 = vmul.f32 %v2403_v28, %v733_v61  ;;  %1384 = vrsqrt.f32 %v2439_v51  ;;  %vm745_vm4 = vweird.f32 %v2439_v51 }
 0x130   :  { %v1159_v53 = vadd.f32 %v2371_v41, %v1050_v43  ;;  %v1160_v47 = vadd.f32 %v2377_v23, %v1051_v58  ;;  %v1161_v6 = vadd.f32 %v2379_v13, %v1052_v8  ;;  %v1162_v55 = vadd.f32 %v2384_v56, %v1053_v21  ;;  %v2457_v16 = vpop.eup %1382 }
 0x131   :  { %v933_v38 = vmul.f32 %v698_v34, %v1922_v33  ;;  %v934_v32 = vmul.f32 %v698_v34, %v1925_v22  ;;  %v935_v20 = vmul.f32 %v698_v34, %v1940_v5  ;;  %v936_v52 = vmul.f32 %v698_v34, %v1943_v44  ;;  %v554_v58 = vpop.xlane.xlu2 %553 }
 0x132   :  { %1259 = vst [vmem:[#allocation7 + $0x60] sm:$0xff] %v1159_v53  ;;  %v738_v25 = vsel %vm737_vm15, %v2403_v28, %v734_v0  ;;  %v720_v29 = vmul.f32 %v2457_v16, %v2423_v48  ;;  %1386 = vrsqrt.f32 %v2468_v60  ;;  %vm726_vm0 = vweird.f32 %v2457_v16 }
 0x133   :  { %1260 = vst [vmem:[#allocation7 + $0x68] sm:$0xff] %v1160_v47  ;;  %v1042_v33 = vmul.f32 %v2361_v1, %v933_v38  ;;  %v1043_v22 = vmul.f32 %v2363_v26, %v934_v32  ;;  %v1044_v5 = vmul.f32 %v2365_v31, %v935_v20  ;;  %v1045_v44 = vmul.f32 %v2369_v62, %v936_v52  ;;  %v564_v32 = vpop.xlane.xlu1 %563  ;;  %vm727_vm3 = vmor %vm725_vm1, %vm726_vm0 }
 0x134   :  { %1261 = vst [vmem:[#allocation7 + $0x70] sm:$0xff] %v1161_v6  ;;  %v949_v50 = vmul.f32 %v738_v25, %v1898_v42  ;;  %v950_v54 = vmul.f32 %v738_v25, %v1901_v12  ;;  %v951_v28 = vmul.f32 %v738_v25, %v1904_v4  ;;  %v952_v3 = vmul.f32 %v738_v25, %v1907_v11 }
 0x135   :  { %v1385_v40 = vpop.eup %1384  ;;  %1262 = vst [vmem:[#allocation7 + $0x78] sm:$0xff] %v1162_v55  ;;  %v1151_v35 = vadd.f32 %v2371_v41, %v1042_v33  ;;  %v1152_v63 = vadd.f32 %v2377_v23, %v1043_v22  ;;  %v1153_v9 = vadd.f32 %v2379_v13, %v1044_v5  ;;  %v1154_v61 = vadd.f32 %v2384_v56, %v1045_v44  ;;  %v559_v44 = vpop.xlane.xlu0 %558 }
 0x136   :  { %v1058_v24 = vmul.f32 %v2361_v1, %v949_v50  ;;  %v1059_v42 = vmul.f32 %v2363_v26, %v950_v54  ;;  %v1060_v12 = vmul.f32 %v2365_v31, %v951_v28  ;;  %v1061_v4 = vmul.f32 %v2369_v62, %v952_v3  ;;  %v3301_v28 = vld [vmem:[#allocation59_spill] sm:$0xff] }
 0x137   :  { %1251 = vst [vmem:[#allocation7 + $0x20] sm:$0xff] %v1151_v35  ;;  %v721_v11 = vmul.f32 %v2457_v16, %v720_v29  ;;  %v740_v43 = vmul.f32 %v1385_v40, %v2439_v51  ;;  %v636_v47 = vmul.f32 0.001953125, %v539_v15  ;;  %v638_v55 = vmul.f32 0.001953125, %v549_v10  ;;  %v3302_v35 = vld [vmem:[#allocation60_spill] sm:$0xff] }
 0x138   :  { %1252 = vst [vmem:[#allocation7 + $0x28] sm:$0xff] %v1152_v63  ;;  %v1167_v8 = vadd.f32 %v2371_v41, %v1058_v24  ;;  %v1168_v21 = vadd.f32 %v2377_v23, %v1059_v42  ;;  %v1169_v34 = vadd.f32 %v2379_v13, %v1060_v12  ;;  %v1170_v6 = vadd.f32 %v2384_v56, %v1061_v4  ;;  %v2501_v33 = vpop.eup %1386  ;;  %v3304_v24 = vld [vmem:[#allocation66_spill] sm:$0xff] }
 0x139   :  { %1253 = vst [vmem:[#allocation7 + $0x30] sm:$0xff] %v1153_v9  ;;  %v722_v0 = vmul.f32 0.5, %v721_v11  ;;  %v741_v53 = vmul.f32 %v1385_v40, %v740_v43  ;;  %v639_v38 = vmul.f32 0.001953125, %v554_v58  ;;  %v2494_v25 = vadd.f32 1e-06, %v636_v47  ;;  %v3303_v9 = vld [vmem:[#allocation61_spill] sm:$0xff]  ;;  %v569_v47 = vpop.xlane.xlu2 %568 }
 0x13a   :  { %1254 = vst [vmem:[#allocation7 + $0x38] sm:$0xff] %v1154_v61  ;;  %vm746_vm2 = vweird.f32 %v1385_v40  ;;  %v2497_v29 = vadd.f32 1e-06, %v638_v55  ;;  %v641_v5 = vmul.f32 0.001953125, %v564_v32  ;;  %v760_v48 = vmul.f32 %v2501_v33, %v2468_v60 }
 0x13b   :  { %1267 = vst [vmem:[#allocation7 + $0xa0] sm:$0xff] %v1167_v8  ;;  %v723_v20 = vsub.f32 1.5, %v722_v0  ;;  %v742_v52 = vmul.f32 0.5, %v741_v53  ;;  %v2499_v15 = vadd.f32 1e-06, %v639_v38  ;;  %1388 = vrsqrt.f32 %v2494_v25  ;;  %vm747_vm5 = vmor %vm745_vm4, %vm746_vm2 }
 0x13c   :  { %1268 = vst [vmem:[#allocation7 + $0xa8] sm:$0xff] %v1168_v21  ;;  %1390 = vrsqrt.f32 %v2497_v29  ;;  %v761_v4 = vmul.f32 %v2501_v33, %v760_v48  ;;  %v2519_v11 = vadd.f32 1e-06, %v641_v5  ;;  %vm765_vm6 = vweird.f32 %v2468_v60 }
 0x13d   :  { %1269 = vst [vmem:[#allocation7 + $0xb0] sm:$0xff] %v1169_v34  ;;  %v724_v10 = vmul.f32 %v2457_v16, %v723_v20  ;;  %v743_v22 = vsub.f32 1.5, %v742_v52  ;;  %1392 = vrsqrt.f32 %v2499_v15  ;;  %v642_v48 = vmul.f32 0.001953125, %v569_v47 }
 0x13e   :  { %1270 = vst [vmem:[#allocation7 + $0xb8] sm:$0xff] %v1170_v6  ;;  %vm766_vm7 = vweird.f32 %v2501_v33  ;;  %vm755_vm8 = vweird.f32 %v2494_v25  ;;  %1394 = vrsqrt.f32 %v2519_v11  ;;  %vm775_vm9 = vweird.f32 %v2497_v29 }
 0x13f   :  { %v728_v50 = vsel %vm727_vm3, %v2457_v16, %v724_v10  ;;  %v744_v54 = vmul.f32 %v1385_v40, %v743_v22  ;;  %v640_v16 = vmul.f32 0.001953125, %v559_v44  ;;  %v762_v10 = vmul.f32 0.5, %v761_v4  ;;  %vm767_vm10 = vmor %vm765_vm6, %vm766_vm7 }
 0x140   :  { %v945_v3 = vmul.f32 %v728_v50, %v3301_v28  ;;  %v946_v63 = vmul.f32 %v728_v50, %v3302_v35  ;;  %v947_v61 = vmul.f32 %v728_v50, %v3303_v9  ;;  %v948_v42 = vmul.f32 %v728_v50, %v3304_v24 }
 0x141   :  { %v748_v12 = vsel %vm747_vm5, %v1385_v40, %v744_v54  ;;  %v2526_v21 = vpop.eup %1388  ;;  %v2551_v54 = vadd.f32 1e-06, %v640_v16  ;;  %v2570_v16 = vadd.f32 1e-06, %v642_v48  ;;  %vm785_vm0 = vweird.f32 %v2499_v15  ;;  %v3308_v48 = vld [vmem:[#allocation74_spill] sm:$0xff] }
 0x142   :  { %v1054_v51 = vmul.f32 %v2361_v1, %v945_v3  ;;  %v1055_v43 = vmul.f32 %v2363_v26, %v946_v63  ;;  %v1056_v58 = vmul.f32 %v2365_v31, %v947_v61  ;;  %v1057_v8 = vmul.f32 %v2369_v62, %v948_v42  ;;  %v2532_v6 = vpop.eup %1390 }
 0x143   :  { %v953_v34 = vmul.f32 %v748_v12, %v1975_v17  ;;  %v954_v40 = vmul.f32 %v748_v12, %v1978_v39  ;;  %v955_v0 = vmul.f32 %v748_v12, %v1988_v27  ;;  %v956_v53 = vmul.f32 %v748_v12, %v1991_v46  ;;  %v2538_v52 = vpop.eup %1392 }
 0x144   :  { %v1163_v55 = vadd.f32 %v2371_v41, %v1054_v51  ;;  %v1164_v38 = vadd.f32 %v2377_v23, %v1055_v43  ;;  %v1165_v32 = vadd.f32 %v2379_v13, %v1056_v58  ;;  %v1166_v20 = vadd.f32 %v2384_v56, %v1057_v8 }
 0x145   :  { %v1062_v17 = vmul.f32 %v2361_v1, %v953_v34  ;;  %v1063_v39 = vmul.f32 %v2363_v26, %v954_v40  ;;  %v1064_v27 = vmul.f32 %v2365_v31, %v955_v0  ;;  %v1065_v46 = vmul.f32 %v2369_v62, %v956_v53 }
 0x146   :  { %1263 = vst [vmem:[#allocation7 + $0x80] sm:$0xff] %v1163_v55  ;;  %v750_v22 = vmul.f32 %v2526_v21, %v2494_v25  ;;  %v770_v5 = vmul.f32 %v2532_v6, %v2497_v29  ;;  %v763_v3 = vsub.f32 1.5, %v762_v10  ;;  %v780_v61 = vmul.f32 %v2538_v52, %v2499_v15  ;;  %v3306_v10 = vld [vmem:[#allocation70_spill] sm:$0xff]  ;;  %v3315_v15 = vld [vmem:[#allocation12_spill] sm:$0xff] }
 0x147   :  { %1264 = vst [vmem:[#allocation7 + $0x88] sm:$0xff] %v1164_v38  ;;  %v1171_v44 = vadd.f32 %v2371_v41, %v1062_v17  ;;  %v1172_v50 = vadd.f32 %v2377_v23, %v1063_v39  ;;  %v1173_v28 = vadd.f32 %v2379_v13, %v1064_v27  ;;  %v1174_v9 = vadd.f32 %v2384_v56, %v1065_v46  ;;  %v3305_v46 = vld [vmem:[#allocation69_spill] sm:$0xff] }
 0x148   :  { %1265 = vst [vmem:[#allocation7 + $0x90] sm:$0xff] %v1165_v32  ;;  %v751_v35 = vmul.f32 %v2526_v21, %v750_v22  ;;  %v771_v63 = vmul.f32 %v2532_v6, %v770_v5  ;;  %v764_v24 = vmul.f32 %v2501_v33, %v763_v3  ;;  %vm756_vm11 = vweird.f32 %v2526_v21  ;;  %v3307_v22 = vld [vmem:[#allocation71_spill] sm:$0xff]  ;;  %v3310_v3 = vld [vmem:[#allocation77_spill] sm:$0xff] }
 0x149   :  { %1266 = vst [vmem:[#allocation7 + $0x98] sm:$0xff] %v1166_v20  ;;  %vm776_vm12 = vweird.f32 %v2532_v6  ;;  %v781_v4 = vmul.f32 %v2538_v52, %v780_v61  ;;  %1396 = vrsqrt.f32 %v2551_v54  ;;  %vm757_vm13 = vmor %vm755_vm8, %vm756_vm11  ;;  %vm786_vm14 = vweird.f32 %v2538_v52  ;;  %v3312_v61 = vld [vmem:[#allocation79_spill] sm:$0xff] }
 0x14a   :  { %1271 = vst [vmem:[#allocation7 + $0xc0] sm:$0xff] %v1171_v44  ;;  %v752_v42 = vmul.f32 0.5, %v751_v35  ;;  %v772_v12 = vmul.f32 0.5, %v771_v63  ;;  %v768_v51 = vsel %vm767_vm10, %v2501_v33, %v764_v24  ;;  %1398 = vrsqrt.f32 %v2570_v16  ;;  %vm777_vm15 = vmor %vm775_vm9, %vm776_vm12  ;;  %v3311_v63 = vld [vmem:[#allocation78_spill] sm:$0xff] }
 0x14b   :  { %1272 = vst [vmem:[#allocation7 + $0xc8] sm:$0xff] %v1172_v50  ;;  %v961_v8 = vmul.f32 %v768_v51, %v1954_v2  ;;  %v962_v60 = vmul.f32 %v768_v51, %v1957_v49  ;;  %v963_v34 = vmul.f32 %v768_v51, %v1967_v36  ;;  %v964_v40 = vmul.f32 %v768_v51, %v1970_v37  ;;  %v2586_v2 = vpop.eup %1394  ;;  %v3309_v50 = vld [vmem:[#allocation76_spill] sm:$0xff]  ;;  %vm787_vm3 = vmor %vm785_vm0, %vm786_vm14 }
 0x14c   :  { %1273 = vst [vmem:[#allocation7 + $0xd0] sm:$0xff] %v1173_v28  ;;  %v753_v43 = vsub.f32 1.5, %v752_v42  ;;  %v773_v58 = vsub.f32 1.5, %v772_v12  ;;  %v782_v53 = vmul.f32 0.5, %v781_v4  ;;  %v800_v32 = vmul.f32 %v2586_v2, %v2519_v11  ;;  %v579_v42 = vpop.xlane.xlu1 %578 }
 0x14d   :  { %1274 = vst [vmem:[#allocation7 + $0xd8] sm:$0xff] %v1174_v9  ;;  %v1070_v49 = vmul.f32 %v2361_v1, %v961_v8  ;;  %v1071_v36 = vmul.f32 %v2363_v26, %v962_v60  ;;  %v1072_v37 = vmul.f32 %v2365_v31, %v963_v34  ;;  %v1073_v47 = vmul.f32 %v2369_v62, %v964_v40  ;;  %v574_v8 = vpop.xlane.xlu0 %573 }
 0x14e   :  { %v754_v0 = vmul.f32 %v2526_v21, %v753_v43  ;;  %v774_v33 = vmul.f32 %v2532_v6, %v773_v58  ;;  %v783_v38 = vsub.f32 1.5, %v782_v53  ;;  %vm805_vm1 = vweird.f32 %v2519_v11 }
 0x14f   :  { %v1179_v20 = vadd.f32 %v2371_v41, %v1070_v49  ;;  %v1180_v17 = vadd.f32 %v2377_v23, %v1071_v36  ;;  %v1181_v39 = vadd.f32 %v2379_v13, %v1072_v37  ;;  %v1182_v27 = vadd.f32 %v2384_v56, %v1073_v47  ;;  %v2605_v29 = vpop.eup %1396 }
 0x150   :  { %v758_v25 = vsel %vm757_vm13, %v2526_v21, %v754_v0  ;;  %v778_v55 = vsel %vm777_vm15, %v2532_v6, %v774_v33  ;;  %v2615_v12 = vpop.eup %1398  ;;  %v644_v36 = vmul.f32 0.001953125, %v579_v42  ;;  %vm795_vm2 = vweird.f32 %v2551_v54 }
 0x151   :  { %v957_v21 = vmul.f32 %v758_v25, %v3305_v46  ;;  %v958_v6 = vmul.f32 %v758_v25, %v3306_v10  ;;  %v959_v5 = vmul.f32 %v758_v25, %v3307_v22  ;;  %v960_v44 = vmul.f32 %v758_v25, %v3308_v48  ;;  %1279 = vst [vmem:[#allocation7 + $0x100] sm:$0xff] %v1179_v20  ;;  %v3313_v22 = vld [vmem:[#allocation72_spill] sm:$0xff]  ;;  %v3314_v48 = vld [vmem:[#allocation73_spill] sm:$0xff] }
 0x152   :  { %v965_v28 = vmul.f32 %v778_v55, %v3309_v50  ;;  %v966_v35 = vmul.f32 %v778_v55, %v3310_v3  ;;  %v967_v9 = vmul.f32 %v778_v55, %v3311_v63  ;;  %v968_v24 = vmul.f32 %v778_v55, %v3312_v61  ;;  %1280 = vst [vmem:[#allocation7 + $0x108] sm:$0xff] %v1180_v17 }
 0x153   :  { %v1066_v4 = vmul.f32 %v2361_v1, %v957_v21  ;;  %v1067_v51 = vmul.f32 %v2363_v26, %v958_v6  ;;  %v1068_v43 = vmul.f32 %v2365_v31, %v959_v5  ;;  %v1069_v58 = vmul.f32 %v2369_v62, %v960_v44  ;;  %1281 = vst [vmem:[#allocation7 + $0x110] sm:$0xff] %v1181_v39 }
 0x154   :  { %v1074_v60 = vmul.f32 %v2361_v1, %v965_v28  ;;  %v1075_v34 = vmul.f32 %v2363_v26, %v966_v35  ;;  %v1076_v40 = vmul.f32 %v2365_v31, %v967_v9  ;;  %v1077_v0 = vmul.f32 %v2369_v62, %v968_v24  ;;  %1282 = vst [vmem:[#allocation7 + $0x118] sm:$0xff] %v1182_v27  ;;  %v3316_v28 = vld [vmem:[#allocation14_spill] sm:$0xff] }
 0x155   :  { %v1175_v33 = vadd.f32 %v2371_v41, %v1066_v4  ;;  %v1176_v53 = vadd.f32 %v2377_v23, %v1067_v51  ;;  %v1177_v49 = vadd.f32 %v2379_v13, %v1068_v43  ;;  %v1178_v37 = vadd.f32 %v2384_v56, %v1069_v58 }
 0x156   :  { %v1183_v47 = vadd.f32 %v2371_v41, %v1074_v60  ;;  %v643_v25 = vmul.f32 0.001953125, %v574_v8  ;;  %v1184_v55 = vadd.f32 %v2377_v23, %v1075_v34  ;;  %v784_v20 = vmul.f32 %v2538_v52, %v783_v38 }
 0x157   :  { %1275 = vst [vmem:[#allocation7 + $0xe0] sm:$0xff] %v1175_v33  ;;  %v801_v17 = vmul.f32 %v2586_v2, %v800_v32  ;;  %v790_v39 = vmul.f32 %v2605_v29, %v2551_v54  ;;  %v1185_v27 = vadd.f32 %v2379_v13, %v1076_v40  ;;  %v1186_v46 = vadd.f32 %v2384_v56, %v1077_v0 }
 0x158   :  { %1276 = vst [vmem:[#allocation7 + $0xe8] sm:$0xff] %v1176_v53  ;;  %vm806_vm4 = vweird.f32 %v2586_v2  ;;  %v810_v38 = vmul.f32 %v2615_v12, %v2570_v16  ;;  %v788_v32 = vsel %vm787_vm3, %v2538_v52, %v784_v20  ;;  %v2648_v6 = vadd.f32 1e-06, %v644_v36 }
 0x159   :  { %1277 = vst [vmem:[#allocation7 + $0xf0] sm:$0xff] %v1177_v49  ;;  %v802_v21 = vmul.f32 0.5, %v801_v17  ;;  %v791_v10 = vmul.f32 %v2605_v29, %v790_v39  ;;  %v969_v5 = vmul.f32 %v788_v32, %v3313_v22  ;;  %v970_v44 = vmul.f32 %v788_v32, %v3314_v48  ;;  %vm807_vm7 = vmor %vm805_vm1, %vm806_vm4  ;;  %v3317_v49 = vld [vmem:[#allocation17_spill] sm:$0xff]  ;;  %v3320_v17 = vld [vmem:[#allocation27_spill] sm:$0xff] }
 0x15a   :  { %1278 = vst [vmem:[#allocation7 + $0xf8] sm:$0xff] %v1178_v37  ;;  %v971_v50 = vmul.f32 %v788_v32, %v3315_v15  ;;  %v972_v3 = vmul.f32 %v788_v32, %v3316_v28  ;;  %vm796_vm5 = vweird.f32 %v2605_v29  ;;  %v811_v52 = vmul.f32 %v2615_v12, %v810_v38  ;;  %v3318_v37 = vld [vmem:[#allocation18_spill] sm:$0xff]  ;;  %v594_v32 = vpop.xlane.xlu1 %593  ;;  %v3322_v22 = vld [vmem:[#allocation20_spill] sm:$0xff]  ;;  %v3323_v48 = vld [vmem:[#allocation23_spill] sm:$0xff] }
 0x15b   :  { %1283 = vst [vmem:[#allocation7 + $0x120] sm:$0xff] %v1183_v47  ;;  %v803_v35 = vsub.f32 1.5, %v802_v21  ;;  %v792_v63 = vmul.f32 0.5, %v791_v10  ;;  %v1078_v9 = vmul.f32 %v2361_v1, %v969_v5  ;;  %v1079_v61 = vmul.f32 %v2363_v26, %v970_v44  ;;  %vm797_vm8 = vmor %vm795_vm2, %vm796_vm5  ;;  %v3324_v15 = vld [vmem:[#allocation30_spill] sm:$0xff] }
 0x15c   :  { %1284 = vst [vmem:[#allocation7 + $0x128] sm:$0xff] %v1184_v55  ;;  %v1080_v24 = vmul.f32 %v2365_v31, %v971_v50  ;;  %v1081_v42 = vmul.f32 %v2369_v62, %v972_v3  ;;  %vm815_vm6 = vweird.f32 %v2570_v16  ;;  %v812_v43 = vmul.f32 0.5, %v811_v52  ;;  %v3319_v55 = vld [vmem:[#allocation22_spill] sm:$0xff]  ;;  %v589_v52 = vpop.xlane.xlu0 %588 }
 0x15d   :  { %1285 = vst [vmem:[#allocation7 + $0x130] sm:$0xff] %v1185_v27  ;;  %v804_v4 = vmul.f32 %v2586_v2, %v803_v35  ;;  %v793_v51 = vsub.f32 1.5, %v792_v63  ;;  %1400 = vrsqrt.f32 %v2648_v6  ;;  %v1187_v58 = vadd.f32 %v2371_v41, %v1078_v9 }
 0x15e   :  { %1286 = vst [vmem:[#allocation7 + $0x138] sm:$0xff] %v1186_v46  ;;  %v1188_v8 = vadd.f32 %v2377_v23, %v1079_v61  ;;  %v1189_v60 = vadd.f32 %v2379_v13, %v1080_v24  ;;  %v1190_v34 = vadd.f32 %v2384_v56, %v1081_v42  ;;  %v813_v33 = vsub.f32 1.5, %v812_v43 }
 0x15f   :  { %v808_v40 = vsel %vm807_vm7, %v2586_v2, %v804_v4  ;;  %v794_v0 = vmul.f32 %v2605_v29, %v793_v51  ;;  %v2673_v53 = vadd.f32 1e-06, %v643_v25  ;;  %1287 = vst [vmem:[#allocation7 + $0x140] sm:$0xff] %v1187_v58  ;;  %vm816_vm9 = vweird.f32 %v2615_v12  ;;  %v584_v25 = vpop.xlane.xlu2 %583 }
 0x160   :  { %v977_v36 = vmul.f32 %v808_v40, %v3317_v49  ;;  %v978_v47 = vmul.f32 %v808_v40, %v3318_v37  ;;  %v979_v20 = vmul.f32 %v808_v40, %v3319_v55  ;;  %v980_v39 = vmul.f32 %v808_v40, %v3320_v17  ;;  %1288 = vst [vmem:[#allocation7 + $0x148] sm:$0xff] %v1188_v8  ;;  %vm817_vm10 = vmor %vm815_vm6, %vm816_vm9  ;;  %v3325_v40 = vld [vmem:[#allocation15_spill] sm:$0xff]  ;;  %v3327_v49 = vld [vmem:[#allocation21_spill] sm:$0xff] }
 0x161   :  { %v798_v11 = vsel %vm797_vm8, %v2605_v29, %v794_v0  ;;  %v814_v2 = vmul.f32 %v2615_v12, %v813_v33  ;;  %1402 = vrsqrt.f32 %v2673_v53  ;;  %1289 = vst [vmem:[#allocation7 + $0x150] sm:$0xff] %v1189_v60  ;;  %v3321_v29 = vld [vmem:[#allocation19_spill] sm:$0xff]  ;;  %v645_v43 = vmul.f32 0.001953125, %v584_v25  ;;  %v3326_v0 = vld [vmem:[#allocation16_spill] sm:$0xff] }
 0x162   :  { %v1086_v27 = vmul.f32 %v2361_v1, %v977_v36  ;;  %v1087_v46 = vmul.f32 %v2363_v26, %v978_v47  ;;  %v1088_v38 = vmul.f32 %v2365_v31, %v979_v20  ;;  %v1089_v54 = vmul.f32 %v2369_v62, %v980_v39  ;;  %1290 = vst [vmem:[#allocation7 + $0x158] sm:$0xff] %v1190_v34  ;;  %v3328_v36 = vld [vmem:[#allocation24_spill] sm:$0xff] }
 0x163   :  { %v2691_v21 = vpop.eup %1400  ;;  %v973_v10 = vmul.f32 %v798_v11, %v3321_v29  ;;  %v974_v5 = vmul.f32 %v798_v11, %v3322_v22  ;;  %v975_v44 = vmul.f32 %v798_v11, %v3323_v48  ;;  %v976_v50 = vmul.f32 %v798_v11, %v3324_v15 }
 0x164   :  { %v1195_v28 = vadd.f32 %v2371_v41, %v1086_v27  ;;  %v1196_v3 = vadd.f32 %v2377_v23, %v1087_v46  ;;  %v1197_v35 = vadd.f32 %v2379_v13, %v1088_v38  ;;  %v1198_v63 = vadd.f32 %v2384_v56, %v1089_v54 }
 0x165   :  { %v1082_v9 = vmul.f32 %v2361_v1, %v973_v10  ;;  %v1083_v61 = vmul.f32 %v2363_v26, %v974_v5  ;;  %v1084_v24 = vmul.f32 %v2365_v31, %v975_v44  ;;  %v1085_v42 = vmul.f32 %v2369_v62, %v976_v50  ;;  %v609_v5 = vpop.xlane.xlu1 %608 }
 0x166   :  { %1295 = vst [vmem:[#allocation7 + $0x180] sm:$0xff] %v1195_v28  ;;  %v818_v4 = vsel %vm817_vm10, %v2615_v12, %v814_v2  ;;  %v830_v51 = vmul.f32 %v2691_v21, %v2648_v6  ;;  %v2725_v17 = vadd.f32 1e-06, %v645_v43  ;;  %vm836_vm11 = vweird.f32 %v2691_v21  ;;  %v3330_v43 = vld [vmem:[#allocation29_spill] sm:$0xff] }
 0x167   :  { %v2712_v58 = vpop.eup %1402  ;;  %1296 = vst [vmem:[#allocation7 + $0x188] sm:$0xff] %v1196_v3  ;;  %v1191_v8 = vadd.f32 %v2371_v41, %v1082_v9  ;;  %v1192_v60 = vadd.f32 %v2377_v23, %v1083_v61  ;;  %v1193_v34 = vadd.f32 %v2379_v13, %v1084_v24  ;;  %v981_v16 = vmul.f32 %v818_v4, %v3325_v40  ;;  %v599_v38 = vpop.xlane.xlu2 %598  ;;  %v3332_v40 = vld [vmem:[#allocation34_spill] sm:$0xff] }
 0x168   :  { %1297 = vst [vmem:[#allocation7 + $0x190] sm:$0xff] %v1197_v35  ;;  %v982_v33 = vmul.f32 %v818_v4, %v3326_v0  ;;  %v983_v12 = vmul.f32 %v818_v4, %v3327_v49  ;;  %v984_v37 = vmul.f32 %v818_v4, %v3328_v36  ;;  %v1194_v47 = vadd.f32 %v2384_v56, %v1085_v42  ;;  %v604_v3 = vpop.xlane.xlu0 %603  ;;  %v3329_v4 = vld [vmem:[#allocation28_spill] sm:$0xff] }
 0x169   :  { %1298 = vst [vmem:[#allocation7 + $0x198] sm:$0xff] %v1198_v63  ;;  %v831_v55 = vmul.f32 %v2691_v21, %v830_v51  ;;  %v820_v20 = vmul.f32 %v2712_v58, %v2673_v53  ;;  %v1090_v39 = vmul.f32 %v2361_v1, %v981_v16  ;;  %1404 = vrsqrt.f32 %v2725_v17 }
 0x16a   :  { %1291 = vst [vmem:[#allocation7 + $0x160] sm:$0xff] %v1191_v8  ;;  %v1091_v11 = vmul.f32 %v2363_v26, %v982_v33  ;;  %v1092_v2 = vmul.f32 %v2365_v31, %v983_v12  ;;  %v1093_v25 = vmul.f32 %v2369_v62, %v984_v37  ;;  %v647_v15 = vmul.f32 0.001953125, %v594_v32  ;;  %v3333_v37 = vld [vmem:[#allocation31_spill] sm:$0xff] }
 0x16b   :  { %1292 = vst [vmem:[#allocation7 + $0x168] sm:$0xff] %v1192_v60  ;;  %v832_v27 = vmul.f32 0.5, %v831_v55  ;;  %v821_v46 = vmul.f32 %v2712_v58, %v820_v20  ;;  %v1199_v54 = vadd.f32 %v2371_v41, %v1090_v39  ;;  %v646_v50 = vmul.f32 0.001953125, %v589_v52  ;;  %v3331_v60 = vld [vmem:[#allocation25_spill] sm:$0xff]  ;;  %v3334_v55 = vld [vmem:[#allocation32_spill] sm:$0xff] }
 0x16c   :  { %1293 = vst [vmem:[#allocation7 + $0x170] sm:$0xff] %v1193_v34  ;;  %v1200_v29 = vadd.f32 %v2377_v23, %v1091_v11  ;;  %v1201_v10 = vadd.f32 %v2379_v13, %v1092_v2  ;;  %v1202_v22 = vadd.f32 %v2384_v56, %v1093_v25  ;;  %vm835_vm12 = vweird.f32 %v2648_v6 }
 0x16d   :  { %1294 = vst [vmem:[#allocation7 + $0x178] sm:$0xff] %v1194_v47  ;;  %v833_v48 = vsub.f32 1.5, %v832_v27  ;;  %v822_v44 = vmul.f32 0.5, %v821_v46  ;;  %vm826_vm13 = vweird.f32 %v2712_v58  ;;  %v648_v28 = vmul.f32 0.001953125, %v599_v38  ;;  %vm837_vm14 = vmor %vm835_vm12, %vm836_vm11 }
 0x16e   :  { %1299 = vst [vmem:[#allocation7 + $0x1a0] sm:$0xff] %v1199_v54  ;;  %v2741_v9 = vadd.f32 1e-06, %v647_v15  ;;  %v2743_v61 = vadd.f32 1e-06, %v646_v50  ;;  %vm825_vm15 = vweird.f32 %v2673_v53  ;;  %v650_v32 = vmul.f32 0.001953125, %v609_v5  ;;  %v628_v54 = vpop.xlane.xlu1 %627 }
 0x16f   :  { %1300 = vst [vmem:[#allocation7 + $0x1a8] sm:$0xff] %v1200_v29  ;;  %v834_v35 = vmul.f32 %v2691_v21, %v833_v48  ;;  %v823_v63 = vsub.f32 1.5, %v822_v44  ;;  %v2748_v6 = vpop.eup %1404  ;;  %v649_v42 = vmul.f32 0.001953125, %v604_v3  ;;  %vm827_vm0 = vmor %vm825_vm15, %vm826_vm13  ;;  %v2763_v0 = vadd.f32 1e-06, %v648_v28  ;;  %v614_v2 = vpop.xlane.xlu2 %613 }
 0x170   :  { %1301 = vst [vmem:[#allocation7 + $0x1b0] sm:$0xff] %v1201_v10  ;;  %1406 = vrsqrt.f32 %v2741_v9  ;;  %v651_v15 = vmul.f32 0.001953125, %v614_v2  ;;  %vm845_vm1 = vweird.f32 %v2725_v17  ;;  %vm846_vm2 = vweird.f32 %v2748_v6 }
 0x171   :  { %1302 = vst [vmem:[#allocation7 + $0x1b8] sm:$0xff] %v1202_v22  ;;  %v838_v52 = vsel %vm837_vm14, %v2691_v21, %v834_v35  ;;  %v824_v24 = vmul.f32 %v2712_v58, %v823_v63  ;;  %v840_v21 = vmul.f32 %v2748_v6, %v2725_v17  ;;  %1408 = vrsqrt.f32 %v2743_v61  ;;  %vm847_vm5 = vmor %vm845_vm1, %vm846_vm2  ;;  %v3336_v17 = vld [vmem:[#allocation39_spill] sm:$0xff] }
 0x172   :  { %v989_v51 = vmul.f32 %v838_v52, %v3329_v4  ;;  %v990_v8 = vmul.f32 %v838_v52, %v3330_v43  ;;  %v991_v34 = vmul.f32 %v838_v52, %v3331_v60  ;;  %v992_v16 = vmul.f32 %v838_v52, %v3332_v40  ;;  %v619_v40 = vpop.xlane.xlu0 %618 }
 0x173   :  { %v828_v53 = vsel %vm827_vm0, %v2712_v58, %v824_v24  ;;  %v3335_v58 = vld [vmem:[#allocation26_spill] sm:$0xff]  ;;  %v2787_v35 = vadd.f32 1e-06, %v650_v32  ;;  %v653_v63 = vmul.f32 0.001953125, %v628_v54  ;;  %1410 = vrsqrt.f32 %v2763_v0 }
 0x174   :  { %v1098_v33 = vmul.f32 %v2361_v1, %v989_v51  ;;  %v1099_v49 = vmul.f32 %v2363_v26, %v990_v8  ;;  %v1100_v12 = vmul.f32 %v2365_v31, %v991_v34  ;;  %v1101_v36 = vmul.f32 %v2369_v62, %v992_v16 }
 0x175   :  { %v985_v47 = vmul.f32 %v828_v53, %v3333_v37  ;;  %v986_v20 = vmul.f32 %v828_v53, %v3334_v55  ;;  %v987_v39 = vmul.f32 %v828_v53, %v3335_v58  ;;  %v988_v11 = vmul.f32 %v828_v53, %v2163_v59  ;;  %v3337_v58 = vld [vmem:[#allocation38_spill] sm:$0xff] }
 0x176   :  { %v1207_v25 = vadd.f32 %v2371_v41, %v1098_v33  ;;  %v1208_v27 = vadd.f32 %v2377_v23, %v1099_v49  ;;  %v1209_v46 = vadd.f32 %v2379_v13, %v1100_v12  ;;  %v1210_v38 = vadd.f32 %v2384_v56, %v1101_v36  ;;  %v1407_v29 = vpop.eup %1406 }
 0x177   :  { %v1094_v10 = vmul.f32 %v2361_v1, %v985_v47  ;;  %v1095_v22 = vmul.f32 %v2363_v26, %v986_v20  ;;  %v1096_v5 = vmul.f32 %v2365_v31, %v987_v39  ;;  %v1097_v48 = vmul.f32 %v2369_v62, %v988_v11  ;;  %v2783_v50 = vpop.eup %1408 }
 0x178   :  { %1307 = vst [vmem:[#allocation7 + $0x1e0] sm:$0xff] %v1207_v25  ;;  %v841_v59 = vmul.f32 %v2748_v6, %v840_v21  ;;  %v860_v44 = vmul.f32 %v1407_v29, %v2741_v9  ;;  %v850_v51 = vmul.f32 %v2783_v50, %v2743_v61  ;;  %v2795_v8 = vadd.f32 1e-06, %v649_v42 }
 0x179   :  { %1308 = vst [vmem:[#allocation7 + $0x1e8] sm:$0xff] %v1208_v27  ;;  %v1203_v28 = vadd.f32 %v2371_v41, %v1094_v10  ;;  %v1204_v3 = vadd.f32 %v2377_v23, %v1095_v22  ;;  %v1205_v52 = vadd.f32 %v2379_v13, %v1096_v5  ;;  %v1206_v43 = vadd.f32 %v2384_v56, %v1097_v48  ;;  %v2817_v47 = vpop.eup %1410  ;;  %v3339_v22 = vld [vmem:[#allocation40_spill] sm:$0xff] }
 0x17a   :  { %1309 = vst [vmem:[#allocation7 + $0x1f0] sm:$0xff] %v1209_v46  ;;  %v842_v24 = vmul.f32 0.5, %v841_v59  ;;  %v861_v4 = vmul.f32 %v1407_v29, %v860_v44  ;;  %v851_v34 = vmul.f32 %v2783_v50, %v850_v51  ;;  %vm865_vm3 = vweird.f32 %v2741_v9  ;;  %v3338_v9 = vld [vmem:[#allocation37_spill] sm:$0xff] }
 0x17b   :  { %1310 = vst [vmem:[#allocation7 + $0x1f8] sm:$0xff] %v1210_v38  ;;  %vm866_vm4 = vweird.f32 %v1407_v29  ;;  %1412 = vrsqrt.f32 %v2787_v35  ;;  %v2801_v16 = vadd.f32 1e-06, %v651_v15  ;;  %v2804_v33 = vadd.f32 1e-06, %v653_v63 }
 0x17c   :  { %1303 = vst [vmem:[#allocation7 + $0x1c0] sm:$0xff] %v1203_v28  ;;  %v843_v32 = vsub.f32 1.5, %v842_v24  ;;  %v862_v60 = vmul.f32 0.5, %v861_v4  ;;  %v852_v21 = vmul.f32 0.5, %v851_v34  ;;  %vm855_vm6 = vweird.f32 %v2743_v61  ;;  %vm867_vm8 = vmor %vm865_vm3, %vm866_vm4  ;;  %v3340_v34 = vld [vmem:[#allocation41_spill] sm:$0xff] }
 0x17d   :  { %1304 = vst [vmem:[#allocation7 + $0x1c8] sm:$0xff] %v1204_v3  ;;  %vm856_vm7 = vweird.f32 %v2783_v50  ;;  %1414 = vrsqrt.f32 %v2795_v8  ;;  %v2813_v49 = vmul.f32 0.001953125, %v619_v40  ;;  %v870_v25 = vmul.f32 %v2817_v47, %v2763_v0 }
 0x17e   :  { %1305 = vst [vmem:[#allocation7 + $0x1d0] sm:$0xff] %v1205_v52  ;;  %v844_v42 = vmul.f32 %v2748_v6, %v843_v32  ;;  %v863_v53 = vsub.f32 1.5, %v862_v60  ;;  %v853_v37 = vsub.f32 1.5, %v852_v21  ;;  %1416 = vrsqrt.f32 %v2801_v16  ;;  %vm857_vm9 = vmor %vm855_vm6, %vm856_vm7  ;;  %v3342_v21 = vld [vmem:[#allocation36_spill] sm:$0xff] }
 0x17f   :  { %1306 = vst [vmem:[#allocation7 + $0x1d8] sm:$0xff] %v1206_v43  ;;  %1418 = vrsqrt.f32 %v2804_v33  ;;  %vm875_vm10 = vweird.f32 %v2763_v0  ;;  %v871_v4 = vmul.f32 %v2817_v47, %v870_v25  ;;  %vm876_vm11 = vweird.f32 %v2817_v47  ;;  %v3343_v0 = vld [vmem:[#allocation35_spill] sm:$0xff] }
 0x180   :  { %v848_v12 = vsel %vm847_vm5, %v2748_v6, %v844_v42  ;;  %v864_v36 = vmul.f32 %v1407_v29, %v863_v53  ;;  %v854_v6 = vmul.f32 %v2783_v50, %v853_v37  ;;  %vm895_vm12 = vweird.f32 %v2787_v35  ;;  %v3341_v42 = vld [vmem:[#allocation33_spill] sm:$0xff]  ;;  %vm877_vm15 = vmor %vm875_vm10, %vm876_vm11 }
 0x181   :  { %v993_v55 = vmul.f32 %v848_v12, %v2140_v19  ;;  %v994_v20 = vmul.f32 %v848_v12, %v3336_v17  ;;  %v995_v39 = vmul.f32 %v848_v12, %v3337_v58  ;;  %v996_v11 = vmul.f32 %v848_v12, %v2193_v30  ;;  %v2830_v27 = vpop.eup %1412 }
 0x182   :  { %v868_v2 = vsel %vm867_vm8, %v1407_v29, %v864_v36  ;;  %v858_v24 = vsel %vm857_vm9, %v2783_v50, %v854_v6  ;;  %v890_v51 = vmul.f32 %v2830_v27, %v2787_v35  ;;  %vm896_vm13 = vweird.f32 %v2830_v27  ;;  %v3346_v35 = vld [vmem:[#allocation43_spill] sm:$0xff] }
 0x183   :  { %v1102_v19 = vmul.f32 %v2361_v1, %v993_v55  ;;  %v1103_v46 = vmul.f32 %v2363_v26, %v994_v20  ;;  %v1104_v30 = vmul.f32 %v2365_v31, %v995_v39  ;;  %v1105_v38 = vmul.f32 %v2369_v62, %v996_v11  ;;  %v2840_v48 = vpop.eup %1414  ;;  %vm897_vm2 = vmor %vm895_vm12, %vm896_vm13 }
 0x184   :  { %v1001_v54 = vmul.f32 %v868_v2, %v3338_v9  ;;  %v1002_v29 = vmul.f32 %v868_v2, %v2187_v14  ;;  %v1003_v10 = vmul.f32 %v868_v2, %v2207_v7  ;;  %v1004_v5 = vmul.f32 %v868_v2, %v3339_v22  ;;  %v2846_v3 = vpop.eup %1416 }
 0x185   :  { %v1211_v59 = vadd.f32 %v2371_v41, %v1102_v19  ;;  %v1212_v44 = vadd.f32 %v2377_v23, %v1103_v46  ;;  %v1213_v15 = vadd.f32 %v2379_v13, %v1104_v30  ;;  %v1214_v28 = vadd.f32 %v2384_v56, %v1105_v38  ;;  %v2862_v43 = vpop.eup %1418 }
 0x186   :  { %v1110_v63 = vmul.f32 %v2361_v1, %v1001_v54  ;;  %v1111_v14 = vmul.f32 %v2363_v26, %v1002_v29  ;;  %v1112_v7 = vmul.f32 %v2365_v31, %v1003_v10  ;;  %v1113_v52 = vmul.f32 %v2369_v62, %v1004_v5 }
 0x187   :  { %1311 = vst [vmem:[#allocation7 + $0x200] sm:$0xff] %v1211_v59  ;;  %v997_v50 = vmul.f32 %v858_v24, %v2202_v18  ;;  %v998_v40 = vmul.f32 %v858_v24, %v3340_v34  ;;  %v999_v53 = vmul.f32 %v858_v24, %v3341_v42  ;;  %v1000_v12 = vmul.f32 %v858_v24, %v3342_v21  ;;  %v3347_v42 = vld [vmem:[#allocation52_spill] sm:$0xff] }
 0x188   :  { %1312 = vst [vmem:[#allocation7 + $0x208] sm:$0xff] %v1212_v44  ;;  %v1219_v32 = vadd.f32 %v2371_v41, %v1110_v63  ;;  %v1220_v61 = vadd.f32 %v2377_v23, %v1111_v14  ;;  %v1221_v60 = vadd.f32 %v2379_v13, %v1112_v7  ;;  %v1222_v36 = vadd.f32 %v2384_v56, %v1113_v52  ;;  %v3344_v14 = vld [vmem:[#allocation42_spill] sm:$0xff]  ;;  %v3345_v52 = vld [vmem:[#allocation51_spill] sm:$0xff] }
 0x189   :  { %1313 = vst [vmem:[#allocation7 + $0x210] sm:$0xff] %v1213_v15  ;;  %v872_v37 = vmul.f32 0.5, %v871_v4  ;;  %v891_v55 = vmul.f32 %v2830_v27, %v890_v51  ;;  %v880_v17 = vmul.f32 %v2840_v48, %v2795_v8  ;;  %v1106_v20 = vmul.f32 %v2361_v1, %v997_v50 }
 0x18a   :  { %1314 = vst [vmem:[#allocation7 + $0x218] sm:$0xff] %v1214_v28  ;;  %v1107_v18 = vmul.f32 %v2363_v26, %v998_v40  ;;  %v1108_v58 = vmul.f32 %v2365_v31, %v999_v53  ;;  %v1109_v39 = vmul.f32 %v2369_v62, %v1000_v12  ;;  %v900_v25 = vmul.f32 %v2846_v3, %v2801_v16 }
 0x18b   :  { %1319 = vst [vmem:[#allocation7 + $0x240] sm:$0xff] %v1219_v32  ;;  %v873_v11 = vsub.f32 1.5, %v872_v37  ;;  %v892_v2 = vmul.f32 0.5, %v891_v55  ;;  %v881_v6 = vmul.f32 %v2840_v48, %v880_v17  ;;  %v1215_v19 = vadd.f32 %v2371_v41, %v1106_v20 }
 0x18c   :  { %1320 = vst [vmem:[#allocation7 + $0x248] sm:$0xff] %v1220_v61  ;;  %v1216_v46 = vadd.f32 %v2377_v23, %v1107_v18  ;;  %v1217_v30 = vadd.f32 %v2379_v13, %v1108_v58  ;;  %v1218_v38 = vadd.f32 %v2384_v56, %v1109_v39  ;;  %vm885_vm14 = vweird.f32 %v2795_v8  ;;  %v3349_v8 = vld [vmem:[#allocation44_spill] sm:$0xff] }
 0x18d   :  { %1321 = vst [vmem:[#allocation7 + $0x250] sm:$0xff] %v1221_v60  ;;  %v874_v9 = vmul.f32 %v2817_v47, %v873_v11  ;;  %v893_v54 = vsub.f32 1.5, %v892_v2  ;;  %v882_v29 = vmul.f32 0.5, %v881_v6  ;;  %v901_v10 = vmul.f32 %v2846_v3, %v900_v25 }
 0x18e   :  { %1322 = vst [vmem:[#allocation7 + $0x258] sm:$0xff] %v1222_v36  ;;  %vm886_vm0 = vweird.f32 %v2840_v48  ;;  %vm906_vm1 = vweird.f32 %v2846_v3  ;;  %v920_v22 = vmul.f32 %v2862_v43, %v2804_v33  ;;  %v2900_v5 = vadd.f32 1e-06, %v2813_v49 }
 0x18f   :  { %1315 = vst [vmem:[#allocation7 + $0x220] sm:$0xff] %v1215_v19  ;;  %v878_v59 = vsel %vm877_vm15, %v2817_v47, %v874_v9  ;;  %v894_v44 = vmul.f32 %v2830_v27, %v893_v54  ;;  %v883_v15 = vsub.f32 1.5, %v882_v29  ;;  %v902_v28 = vmul.f32 0.5, %v901_v10  ;;  %vm887_vm3 = vmor %vm885_vm14, %vm886_vm0  ;;  %v3352_v9 = vld [vmem:[#allocation48_spill] sm:$0xff] }
 0x190   :  { %1316 = vst [vmem:[#allocation7 + $0x228] sm:$0xff] %v1216_v46  ;;  %v1005_v63 = vmul.f32 %v878_v59, %v3343_v0  ;;  %v1006_v7 = vmul.f32 %v878_v59, %v3344_v14  ;;  %v1007_v24 = vmul.f32 %v878_v59, %v3345_v52  ;;  %v1008_v4 = vmul.f32 %v878_v59, %v2262_v45  ;;  %v3350_v46 = vld [vmem:[#allocation47_spill] sm:$0xff] }
 0x191   :  { %1317 = vst [vmem:[#allocation7 + $0x230] sm:$0xff] %v1217_v30  ;;  %v898_v49 = vsel %vm897_vm2, %v2830_v27, %v894_v44  ;;  %v884_v47 = vmul.f32 %v2840_v48, %v883_v15  ;;  %v903_v51 = vsub.f32 1.5, %v902_v28  ;;  %v921_v32 = vmul.f32 %v2862_v43, %v920_v22  ;;  %v3348_v27 = vld [vmem:[#allocation49_spill] sm:$0xff]  ;;  %v3353_v28 = vld [vmem:[#allocation46_spill] sm:$0xff] }
 0x192   :  { %1318 = vst [vmem:[#allocation7 + $0x238] sm:$0xff] %v1218_v38  ;;  %v1114_v61 = vmul.f32 %v2361_v1, %v1005_v63  ;;  %v1115_v60 = vmul.f32 %v2363_v26, %v1006_v7  ;;  %v1116_v50 = vmul.f32 %v2365_v31, %v1007_v24  ;;  %v1117_v45 = vmul.f32 %v2369_v62, %v1008_v4  ;;  %v3354_v63 = vld [vmem:[#allocation53_spill] sm:$0xff] }
 0x193   :  { %v1013_v34 = vmul.f32 %v898_v49, %v2232_v57  ;;  %v1014_v40 = vmul.f32 %v898_v49, %v3346_v35  ;;  %v1015_v53 = vmul.f32 %v898_v49, %v3347_v42  ;;  %v1016_v21 = vmul.f32 %v898_v49, %v3348_v27  ;;  %v3355_v7 = vld [vmem:[#allocation57_spill] sm:$0xff] }
 0x194   :  { %v1223_v12 = vadd.f32 %v2371_v41, %v1114_v61  ;;  %v1224_v36 = vadd.f32 %v2377_v23, %v1115_v60  ;;  %v1225_v37 = vadd.f32 %v2379_v13, %v1116_v50  ;;  %v1226_v55 = vadd.f32 %v2384_v56, %v1117_v45 }
 0x195   :  { %v1122_v17 = vmul.f32 %v2361_v1, %v1013_v34  ;;  %v1123_v20 = vmul.f32 %v2363_v26, %v1014_v40  ;;  %v1124_v57 = vmul.f32 %v2365_v31, %v1015_v53  ;;  %v1125_v18 = vmul.f32 %v2369_v62, %v1016_v21 }
 0x196   :  { %1323 = vst [vmem:[#allocation7 + $0x260] sm:$0xff] %v1223_v12  ;;  %v888_v58 = vsel %vm887_vm3, %v2840_v48, %v884_v47  ;;  %v904_v39 = vmul.f32 %v2846_v3, %v903_v51  ;;  %v922_v11 = vmul.f32 0.5, %v921_v32  ;;  %1420 = vrsqrt.f32 %v2900_v5  ;;  %v3351_v48 = vld [vmem:[#allocation45_spill] sm:$0xff] }
 0x197   :  { %1324 = vst [vmem:[#allocation7 + $0x268] sm:$0xff] %v1224_v36  ;;  %v1231_v2 = vadd.f32 %v2371_v41, %v1122_v17  ;;  %v1232_v6 = vadd.f32 %v2377_v23, %v1123_v20  ;;  %v1233_v25 = vadd.f32 %v2379_v13, %v1124_v57  ;;  %vm905_vm4 = vweird.f32 %v2801_v16  ;;  %v3359_v17 = vld [vmem:[#allocation56_spill] sm:$0xff]  ;;  %v3360_v57 = vld [vmem:[#allocation58_spill] sm:$0xff] }
 0x198   :  { %1325 = vst [vmem:[#allocation7 + $0x270] sm:$0xff] %v1225_v37  ;;  %v1009_v19 = vmul.f32 %v888_v58, %v3349_v8  ;;  %v1010_v30 = vmul.f32 %v888_v58, %v3350_v46  ;;  %v1011_v38 = vmul.f32 %v888_v58, %v3351_v48  ;;  %v1012_v54 = vmul.f32 %v888_v58, %v3352_v9  ;;  %vm907_vm5 = vmor %vm905_vm4, %vm906_vm1  ;;  %v3358_v37 = vld [vmem:[#allocation80_spill] sm:$0xff] }
 0x199   :  { %1326 = vst [vmem:[#allocation7 + $0x278] sm:$0xff] %v1226_v55  ;;  %v1234_v29 = vadd.f32 %v2384_v56, %v1125_v18  ;;  %v908_v10 = vsel %vm907_vm5, %v2846_v3, %v904_v39  ;;  %v923_v22 = vsub.f32 1.5, %v922_v11  ;;  %vm926_vm6 = vweird.f32 %v2862_v43  ;;  %v3356_v3 = vld [vmem:[#allocation55_spill] sm:$0xff] }
 0x19a   :  { %1331 = vst [vmem:[#allocation7 + $0x2a0] sm:$0xff] %v1231_v2  ;;  %v1118_v16 = vmul.f32 %v2361_v1, %v1009_v19  ;;  %v1119_v59 = vmul.f32 %v2363_v26, %v1010_v30  ;;  %v1120_v44 = vmul.f32 %v2365_v31, %v1011_v38  ;;  %v1121_v15 = vmul.f32 %v2369_v62, %v1012_v54  ;;  %v3361_v38 = vld [vmem:[#allocation50_spill] sm:$0xff] }
 0x19b   :  { %1332 = vst [vmem:[#allocation7 + $0x2a8] sm:$0xff] %v1232_v6  ;;  %v1017_v0 = vmul.f32 %v908_v10, %v3353_v28  ;;  %v1018_v14 = vmul.f32 %v908_v10, %v3354_v63  ;;  %v1019_v52 = vmul.f32 %v908_v10, %v3355_v7  ;;  %v1020_v24 = vmul.f32 %v908_v10, %v3356_v3  ;;  %v3362_v54 = vld [vmem:[#allocation54_spill] sm:$0xff]  ;;  %v3363_v10 = vld [vmem:[#allocation11_spill] sm:$0xff] }
 0x19c   :  { %v1421_v4 = vpop.eup %1420  ;;  %1333 = vst [vmem:[#allocation7 + $0x2b0] sm:$0xff] %v1233_v25  ;;  %v1227_v49 = vadd.f32 %v2371_v41, %v1118_v16  ;;  %v1228_v47 = vadd.f32 %v2377_v23, %v1119_v59  ;;  %v1229_v51 = vadd.f32 %v2379_v13, %v1120_v44  ;;  %v1230_v32 = vadd.f32 %v2384_v56, %v1121_v15  ;;  %v3364_v16 = vld [vmem:[#allocation13_spill] sm:$0xff] }
 0x19d   :  { %1334 = vst [vmem:[#allocation7 + $0x2b8] sm:$0xff] %v1234_v29  ;;  %v1126_v61 = vmul.f32 %v2361_v1, %v1017_v0  ;;  %v1127_v60 = vmul.f32 %v2363_v26, %v1018_v14  ;;  %v1128_v50 = vmul.f32 %v2365_v31, %v1019_v52  ;;  %v1129_v45 = vmul.f32 %v2369_v62, %v1020_v24 }
 0x19e   :  { %1327 = vst [vmem:[#allocation7 + $0x280] sm:$0xff] %v1227_v49  ;;  %v924_v34 = vmul.f32 %v2862_v43, %v923_v22  ;;  %vm925_vm7 = vweird.f32 %v2804_v33  ;;  %v910_v35 = vmul.f32 %v1421_v4, %v2900_v5  ;;  %v3357_v33 = vld [vmem:[#allocation75_spill] sm:$0xff]  ;;  %vm916_vm9 = vweird.f32 %v1421_v4 }
 0x19f   :  { %1328 = vst [vmem:[#allocation7 + $0x288] sm:$0xff] %v1228_v47  ;;  %v1235_v40 = vadd.f32 %v2371_v41, %v1126_v61  ;;  %v1236_v42 = vadd.f32 %v2377_v23, %v1127_v60  ;;  %vm927_vm8 = vmor %vm925_vm7, %vm926_vm6  ;;  %v1237_v53 = vadd.f32 %v2379_v13, %v1128_v50  ;;  %v1238_v27 = vadd.f32 %v2384_v56, %v1129_v45 }
 0x1a0   :  { %1329 = vst [vmem:[#allocation7 + $0x290] sm:$0xff] %v1229_v51  ;;  %v928_v21 = vsel %vm927_vm8, %v2862_v43, %v924_v34  ;;  %v911_v12 = vmul.f32 %v1421_v4, %v910_v35  ;;  %vm915_vm10 = vweird.f32 %v2900_v5 }
 0x1a1   :  { %1330 = vst [vmem:[#allocation7 + $0x298] sm:$0xff] %v1230_v32  ;;  %v1025_v36 = vmul.f32 %v928_v21, %v3357_v33  ;;  %v1026_v55 = vmul.f32 %v928_v21, %v3358_v37  ;;  %v1027_v20 = vmul.f32 %v928_v21, %v3359_v17  ;;  %v1028_v18 = vmul.f32 %v928_v21, %v3360_v57  ;;  %vm917_vm11 = vmor %vm915_vm10, %vm916_vm9 }
 0x1a2   :  { %1335 = vst [vmem:[#allocation7 + $0x2c0] sm:$0xff] %v1235_v40  ;;  %v912_v58 = vmul.f32 0.5, %v911_v12 }
 0x1a3   :  { %1336 = vst [vmem:[#allocation7 + $0x2c8] sm:$0xff] %v1236_v42  ;;  %v1134_v39 = vmul.f32 %v2361_v1, %v1025_v36  ;;  %v1135_v11 = vmul.f32 %v2363_v26, %v1026_v55  ;;  %v1136_v2 = vmul.f32 %v2365_v31, %v1027_v20  ;;  %v1137_v43 = vmul.f32 %v2369_v62, %v1028_v18 }
 0x1a4   :  { %1337 = vst [vmem:[#allocation7 + $0x2d0] sm:$0xff] %v1237_v53  ;;  %v913_v6 = vsub.f32 1.5, %v912_v58 }
 0x1a5   :  { %1338 = vst [vmem:[#allocation7 + $0x2d8] sm:$0xff] %v1238_v27  ;;  %v1243_v25 = vadd.f32 %v2371_v41, %v1134_v39  ;;  %v1244_v8 = vadd.f32 %v2377_v23, %v1135_v11  ;;  %v1245_v19 = vadd.f32 %v2379_v13, %v1136_v2  ;;  %v1246_v46 = vadd.f32 %v2384_v56, %v1137_v43 }
 0x1a6   :  { %v914_v30 = vmul.f32 %v1421_v4, %v913_v6 }
 0x1a7   :  { %1343 = vst [vmem:[#allocation7 + $0x300] sm:$0xf] %v1243_v25 }
 0x1a8   :  { %1344 = vst [vmem:[#allocation7 + $0x308] sm:$0xf] %v1244_v8  ;;  %v918_v48 = vsel %vm917_vm11, %v1421_v4, %v914_v30 }
 0x1a9   :  { %1345 = vst [vmem:[#allocation7 + $0x310] sm:$0xf] %v1245_v19  ;;  %v1021_v9 = vmul.f32 %v918_v48, %v3361_v38  ;;  %v1022_v29 = vmul.f32 %v918_v48, %v3362_v54  ;;  %v1023_v22 = vmul.f32 %v918_v48, %v3363_v10  ;;  %v1024_v59 = vmul.f32 %v918_v48, %v3364_v16 }
 0x1aa   :  { %1346 = vst [vmem:[#allocation7 + $0x318] sm:$0xf] %v1246_v46 }
 0x1ab   :  { %v1130_v44 = vmul.f32 %v2361_v1, %v1021_v9  ;;  %v1131_v15 = vmul.f32 %v2363_v26, %v1022_v29  ;;  %v1132_v5 = vmul.f32 %v2365_v31, %v1023_v22  ;;  %v1133_v28 = vmul.f32 %v2369_v62, %v1024_v59 }
 0x1ad   :  { %v1239_v0 = vadd.f32 %v2371_v41, %v1130_v44  ;;  %v1240_v63 = vadd.f32 %v2377_v23, %v1131_v15  ;;  %v1241_v14 = vadd.f32 %v2379_v13, %v1132_v5  ;;  %v1242_v1 = vadd.f32 %v2384_v56, %v1133_v28 }
 0x1af   :  { %1339 = vst [vmem:[#allocation7 + $0x2e0] sm:$0xff] %v1239_v0 }
 0x1b0   :  { %1340 = vst [vmem:[#allocation7 + $0x2e8] sm:$0xff] %v1240_v63 }
 0x1b1   :  { %1341 = vst [vmem:[#allocation7 + $0x2f0] sm:$0xff] %v1241_v14 }
 0x1b2   :  { %1342 = vst [vmem:[#allocation7 + $0x2f8] sm:$0xff] %v1242_v1 }
 0x1b3   :  { %1359 = dma.vmem_to_hbm [thread:$0]  %s1352_s1, 12800, %s1354_s23, [#allocation4], %s1501_s17, %s1501_s17, %s1502_s18  }
 0x1b4   :  { %1498 = dma.done.wait [#allocation4], 12800  }
 0x1b5   :  { %1499 = vsyncadd [#allocation4], 4294954496 }
 0x1b6   :  { %1364 = vsyncpa [#allocation3], 1 }
 0x1b7   :  { %1365 = vsyncpa [#allocation6], 1 }
 0x1b8   :  { %1366 = vsyncpa [#allocation4], 1 }

</bundles_post_ra>
